<compile_context>
chip_gen: v7x
topology: tpu7x:2x2x1
jax: 0.10.0
libtpu: 0.0.40
codegen_flags: <defaults>
</compile_context>

<pallas_src>
import functools

import numpy as np

import jax
import jax.numpy as jnp
from jax.experimental import pallas as pl
from jax.experimental.pallas import tpu as pltpu

POOL_SIZES = (1, 2, 3, 6)                   # fixed by PyramidPool
P_TOTAL = sum(s * s for s in POOL_SIZES)    # 50 pooled positions
P_PAD = 128                                 # lane-padded pooled-position axis


# --------------------------------------------------------------------------
# helpers
# --------------------------------------------------------------------------
def _vmem_budget_bytes():
    """Generation-aware VMEM budget (~3/4 of physical capacity, capped)."""
    cap = 0
    try:
        cap = int(pltpu.get_tpu_info().vmem_capacity_bytes)
    except Exception:
        cap = 0
    if cap <= 0:
        try:
            kind = jax.devices()[0].device_kind.lower()
        except Exception:
            kind = ""
        # v7x has 64 MiB VMEM per TensorCore; v5e/v6e have 128 MiB.
        cap = (64 << 20) if "v7" in kind else (128 << 20)
    return max(16 << 20, min(3 * cap // 4, 96 << 20))


def _pick_tile(dim, target, multiple):
    """Largest divisor of `dim` that is <= target and a multiple of `multiple`,
    else the full extent (a full-extent block dim is always legal)."""
    if dim <= target:
        return dim
    t = max(multiple, (target // multiple) * multiple)
    for d in range(t, 0, -multiple):
        if dim % d == 0:
            return d
    return dim


def _build_pool_matrix(h, w):
    """(H*W, P_PAD): column off_s + i*s + j averages the AdaptiveAvgPool2d
    window (i, j) for pyramid size s (PyTorch start/end index rule)."""
    mat = np.zeros((h * w, P_PAD), np.float32)
    off = 0
    for s in POOL_SIZES:
        for i in range(s):
            r0, r1 = (i * h) // s, -((-(i + 1) * h) // s)
            for j in range(s):
                c0, c1 = (j * w) // s, -((-(j + 1) * w) // s)
                win = np.zeros((h, w), np.float32)
                win[r0:r1, c0:c1] = 1.0 / ((r1 - r0) * (c1 - c0))
                mat[:, off + i * s + j] = win.reshape(-1)
        off += s * s
    return mat


def _linear_weights(s, out_s):
    """(out_s, s) bilinear interpolation weights, align_corners=True."""
    w = np.zeros((out_s, s), np.float32)
    for y in range(out_s):
        src = 0.0 if (out_s == 1 or s == 1) else y * (s - 1) / (out_s - 1)
        i0 = min(int(np.floor(src)), s - 1)
        i1 = min(i0 + 1, s - 1)
        f = src - i0
        w[y, i0] += 1.0 - f
        w[y, i1] += f
    return w


def _build_upsample_matrices(out_h, out_w):
    """(4, P_PAD, out_h*out_w); rows outside a branch's pooled-column range are
    zero, so padded / foreign lanes never contribute."""
    mats = np.zeros((len(POOL_SIZES), P_PAD, out_h * out_w), np.float32)
    off = 0
    for k, s in enumerate(POOL_SIZES):
        wy = _linear_weights(s, out_h)                       # (out_h, s)
        wx = _linear_weights(s, out_w)                       # (out_w, s)
        full = np.einsum("yi,xj->ijyx", wy, wx).reshape(s * s, out_h * out_w)
        mats[k, off:off + s * s, :] = full
        off += s * s
    return mats


# --------------------------------------------------------------------------
# kernels
# --------------------------------------------------------------------------
def _pool_kernel(x_ref, pmat_ref, out_ref):
    # All four adaptive avg-pools at once: (TM, HK) @ (HK, 128), accumulated
    # over the HW-reduction grid axis into the resident f32 output block.
    @pl.when(pl.program_id(1) == 0)
    def _():
        out_ref[...] = jnp.zeros_like(out_ref)

    out_ref[...] += jnp.dot(x_ref[...], pmat_ref[...],
                            preferred_element_type=jnp.float32)


def _conv_bn_relu_upsample_kernel(w_ref, b_ref, pooled_ref, uw_ref, out_ref):
    # Fused K2+K3: (co_t, Ci)@(Ci, 128) + bias -> ReLU -> (co_t,128)@(128, SS).
    # The activation tile never leaves VMEM/vregs; the output block lands
    # directly at its channel-concat position in the NCHW result.
    z = jnp.dot(w_ref[0], pooled_ref[0], preferred_element_type=jnp.float32)
    z = jnp.maximum(z + b_ref[0], 0.0)          # (co_t, 1) bias broadcast
    out_ref[0, 0] = jnp.dot(
        z, uw_ref[0], preferred_element_type=jnp.float32
    ).astype(out_ref.dtype)


# --------------------------------------------------------------------------
# module wrapper
# --------------------------------------------------------------------------
def init_pyramid_pool_params(key, in_channels, out_channels):
    params = []
    for k in jax.random.split(key, len(POOL_SIZES)):
        kw, kb, kg, kbt, km, kv = jax.random.split(k, 6)
        params.append(dict(
            conv_w=jax.random.normal(kw, (out_channels, in_channels),
                                     jnp.float32) / np.sqrt(in_channels),
            conv_b=jax.random.normal(kb, (out_channels,), jnp.float32) * 0.1,
            bn_gamma=jax.random.uniform(kg, (out_channels,), jnp.float32,
                                        0.5, 1.5),
            bn_beta=jax.random.normal(kbt, (out_channels,), jnp.float32) * 0.1,
            bn_mean=jax.random.normal(km, (out_channels,), jnp.float32) * 0.1,
            bn_var=jax.random.uniform(kv, (out_channels,), jnp.float32,
                                      0.5, 1.5),
        ))
    return params


def pyramid_pool_forward(params, x, out_size, eps=1e-5):
    """x: (B, C_in, H, W) -> (B, 4*C_out, out_h, out_w), NCHW like PyTorch."""
    b, c_in, h, w = x.shape
    out_h, out_w = out_size
    c_out = params[0]["conv_w"].shape[0]
    nb = len(POOL_SIZES)
    hw, ss, m = h * w, out_h * out_w, b * c_in
    budget = _vmem_budget_bytes()

    # TODO(synk): BatchNorm2d is applied in inference mode (running stats) and
    # folded into the 1x1 conv; training-mode batch statistics are not modeled.
    wf, bf = [], []
    for p in params:
        inv = p["bn_gamma"] * jax.lax.rsqrt(p["bn_var"] + eps)
        wf.append(p["conv_w"] * inv[:, None])
        bf.append((p["conv_b"] - p["bn_mean"]) * inv + p["bn_beta"])
    wf = jnp.stack(wf)                          # (4, C_out, C_in)
    bf = jnp.stack(bf)[:, :, None]              # (4, C_out, 1)

    pmat = jnp.asarray(_build_pool_matrix(h, w))               # (HW, 128)
    uw = jnp.asarray(_build_upsample_matrices(out_h, out_w))   # (4, 128, SS)

    def cparams(sem):
        return pltpu.CompilerParams(dimension_semantics=sem,
                                    vmem_limit_bytes=budget)

    # ---- K1: adaptive average pooling (single full read of x) --------------
    # HW contraction is tiled with a reduction grid axis so the pmat / x
    # blocks stay within the per-generation VMEM budget even for large maps.
    x2d = x.reshape(m, hw)                      # pure reshape, no copy
    hk = _pick_tile(hw, 8192, 128)              # pmat block <= ~4 MiB
    tm = _pick_tile(m, max(8, (budget // 6) // (hk * 4)), 8)
    pooled = pl.pallas_call(
        _pool_kernel,
        out_shape=jax.ShapeDtypeStruct((m, P_PAD), jnp.float32),
        grid=(m // tm, hw // hk),
        in_specs=[pl.BlockSpec((tm, hk), lambda i, k: (i, k)),
                  pl.BlockSpec((hk, P_PAD), lambda i, k: (k, 0))],
        out_specs=pl.BlockSpec((tm, P_PAD), lambda i, k: (i, 0)),
        compiler_params=cparams(("parallel", "arbitrary")),
    )(x2d, pmat)
    pooled = pooled.reshape(b, c_in, P_PAD)

    # ---- Fused K2+K3: 1x1 conv + folded BN + ReLU -> bilinear upsample -----
    # VMEM plan (double-buffered): fixed = uw + pooled blocks; per-channel-row
    # cost = out + weight blocks.  Grow the channel tile toward the budget.
    fixed = 2 * P_PAD * ss * 4 + 2 * c_in * P_PAD * 4
    per_co = 2 * ss * 4 + 2 * c_in * 4 + 8
    co_t = _pick_tile(c_out, max(8, (int(budget * 0.85) - fixed) // per_co), 8)
    # TODO(synk): if 128*SS*4 alone exceeded the VMEM budget (extremely large
    # upsample targets), the SS axis would also need tiling; not needed here.

    out = pl.pallas_call(
        _conv_bn_relu_upsample_kernel,
        out_shape=jax.ShapeDtypeStruct((b, nb, c_out, ss), x.dtype),
        grid=(nb, c_out // co_t, b),            # batch innermost: wf resident
        in_specs=[pl.BlockSpec((1, co_t, c_in), lambda s, c, bb: (s, c, 0)),
                  pl.BlockSpec((1, co_t, 1), lambda s, c, bb: (s, c, 0)),
                  pl.BlockSpec((1, c_in, P_PAD), lambda s, c, bb: (bb, 0, 0)),
                  pl.BlockSpec((1, P_PAD, ss), lambda s, c, bb: (s, 0, 0))],
        out_specs=pl.BlockSpec((1, 1, co_t, ss),
                               lambda s, c, bb: (bb, s, c, 0)),
        compiler_params=cparams(("parallel", "parallel", "parallel")),
    )(wf, bf, pooled, uw)

    return out.reshape(b, nb * c_out, out_h, out_w)


# --------------------------------------------------------------------------
# pure-JAX reference (independent of the kernel matrices)
# --------------------------------------------------------------------------
def _adaptive_avg_pool_ref(x, s):
    _, _, h, w = x.shape
    rows = []
    for i in range(s):
        r0, r1 = (i * h) // s, -((-(i + 1) * h) // s)
        cols = []
        for j in range(s):
            c0, c1 = (j * w) // s, -((-(j + 1) * w) // s)
            cols.append(jnp.mean(x[:, :, r0:r1, c0:c1], axis=(2, 3)))
        rows.append(jnp.stack(cols, axis=-1))
    return jnp.stack(rows, axis=-2)             # (B, C, s, s)


def _bilinear_upsample_ref(z, out_h, out_w):
    _, _, s, _ = z.shape

    def coords(out_s):
        if out_s == 1 or s == 1:
            src = jnp.zeros((out_s,), jnp.float32)
        else:
            src = jnp.arange(out_s, dtype=jnp.float32) * ((s - 1) / (out_s - 1))
        i0 = jnp.clip(jnp.floor(src).astype(jnp.int32), 0, s - 1)
        i1 = jnp.clip(i0 + 1, 0, s - 1)
        return i0, i1, src - i0.astype(jnp.float32)

    r0, r1, rf = coords(out_h)
    c0, c1, cf = coords(out_w)
    rows = (z[:, :, r0, :] * (1.0 - rf)[None, None, :, None]
            + z[:, :, r1, :] * rf[None, None, :, None])
    return rows[:, :, :, c0] * (1.0 - cf) + rows[:, :, :, c1] * cf


def pyramid_pool_reference(params, x, out_size, eps=1e-5):
    outs = []
    for p, s in zip(params, POOL_SIZES):
        y = _adaptive_avg_pool_ref(x, s)
        y = (jnp.einsum("oc,bcij->boij", p["conv_w"], y, precision="highest")
             + p["conv_b"][None, :, None, None])
        inv = (p["bn_gamma"] * jax.lax.rsqrt(p["bn_var"] + eps))
        y = (y - p["bn_mean"][None, :, None, None]) * inv[None, :, None, None] \
            + p["bn_beta"][None, :, None, None]
        y = jnp.maximum(y, 0.0)
        outs.append(_bilinear_upsample_ref(y, *out_size))
    return jnp.concatenate(outs, axis=1)


# --------------------------------------------------------------------------
if __name__ == "__main__":
    key = jax.random.PRNGKey(0)
    kx, kp = jax.random.split(key)

    # Small shapes consistent with the module (NCHW input, pyramid 1/2/3/6).
    B, C_IN, H, W = 2, 64, 16, 16
    C_OUT = 32
    OUT_SIZE = (32, 32)

    x = jax.random.normal(kx, (B, C_IN, H, W), dtype=jnp.float32)
    params = init_pyramid_pool_params(kp, C_IN, C_OUT)

    fwd = jax.jit(functools.partial(pyramid_pool_forward, out_size=OUT_SIZE))
    out = jax.block_until_ready(fwd(params, x))

    ref = pyramid_pool_reference(params, x, OUT_SIZE)
    assert out.shape == (B, len(POOL_SIZES) * C_OUT, *OUT_SIZE), out.shape
    # Tolerance accounts for TPU default matmul precision (bf16-pass MXU).
    assert jnp.allclose(out, ref, rtol=1e-2, atol=1e-2), float(
        jnp.max(jnp.abs(out - ref)))

    print("KERNEL_OK")
</pallas_src>

<mosaic_0001>
module attributes {stable_mosaic.version = 11 : i64} {
  func.func @_pool_kernel(%arg0: i32, %arg1: i32, %arg2: memref<128x256xf32, #tpu.memory_space<vmem>>, %arg3: memref<256x128xf32, #tpu.memory_space<vmem>>, %arg4: memref<128x128xf32, #tpu.memory_space<vmem>>) attributes {dimension_semantics = [#tpu.dimension_semantics<parallel>, #tpu.dimension_semantics<arbitrary>], iteration_bounds = array<i64: 1, 1>, scalar_prefetch = 0 : i64, scratch_operands = 0 : i64, tpu.core_type = #tpu.core_type<tc>, window_params = [{transform_indices = @transform_0, window_bounds = array<i64: 128, 256>}, {transform_indices = @transform_1, window_bounds = array<i64: 256, 128>}, {transform_indices = @transform_2, window_bounds = array<i64: 128, 128>}]} {
    %c0_i32 = arith.constant 0 : i32
    %0 = arith.cmpi eq, %arg1, %c0_i32 : i32
    %1 = arith.extui %0 : i1 to i32
    %c0_i32_0 = arith.constant 0 : i32
    %2 = arith.cmpi ne, %1, %c0_i32_0 : i32
    scf.if %2 {
      %cst_8 = arith.constant 0.000000e+00 : f32
      %9 = vector.broadcast %cst_8 : f32 to vector<128x128xf32>
      %c0_9 = arith.constant 0 : index
      %c0_10 = arith.constant 0 : index
      %10 = vector.load %arg4[%c0_9, %c0_10] : memref<128x128xf32, #tpu.memory_space<vmem>>, vector<128x128xf32>
      tpu.vector_store %arg4[%c0_9, %c0_10], %9 {strides = array<i32>} : memref<128x128xf32, #tpu.memory_space<vmem>>, vector<128x128xf32>,
    } else {
    }
    %c0 = arith.constant 0 : index
    %c0_1 = arith.constant 0 : index
    %3 = vector.load %arg4[%c0, %c0_1] : memref<128x128xf32, #tpu.memory_space<vmem>>, vector<128x128xf32>
    %c0_2 = arith.constant 0 : index
    %c0_3 = arith.constant 0 : index
    %4 = vector.load %arg2[%c0_2, %c0_3] : memref<128x256xf32, #tpu.memory_space<vmem>>, vector<128x256xf32>
    %c0_4 = arith.constant 0 : index
    %c0_5 = arith.constant 0 : index
    %5 = vector.load %arg3[%c0_4, %c0_5] : memref<256x128xf32, #tpu.memory_space<vmem>>, vector<256x128xf32>
    %cst = arith.constant dense<0.000000e+00> : vector<128x128xf32>
    %6 = tpu.matmul %4, %5, %cst {dimension_numbers = #tpu.dot_dimension_numbers<[1], [0], [0], [1], [0, 0, 1, 1], [], []>} : vector<128x256xf32>, vector<256x128xf32>, vector<128x128xf32> -> vector<128x128xf32>
    %7 = arith.addf %3, %6 : vector<128x128xf32>
    %c0_6 = arith.constant 0 : index
    %c0_7 = arith.constant 0 : index
    %8 = vector.load %arg4[%c0_6, %c0_7] : memref<128x128xf32, #tpu.memory_space<vmem>>, vector<128x128xf32>
    tpu.vector_store %arg4[%c0_6, %c0_7], %7 {strides = array<i32>} : memref<128x128xf32, #tpu.memory_space<vmem>>, vector<128x128xf32>,
    return
  }
  func.func @transform_0(%arg0: i32, %arg1: i32) -> (i32, i32) {
    %c0_i32 = arith.constant 0 : i32
    return %arg0, %arg1 : i32, i32
  }
  func.func @transform_1(%arg0: i32, %arg1: i32) -> (i32, i32) {
    %c0_i32 = arith.constant 0 : i32
    %c0_i32_0 = arith.constant 0 : i32
    return %arg1, %c0_i32 : i32, i32
  }
  func.func @transform_2(%arg0: i32, %arg1: i32) -> (i32, i32) {
    %c0_i32 = arith.constant 0 : i32
    %c0_i32_0 = arith.constant 0 : i32
    return %arg0, %c0_i32 : i32, i32
  }
}

module attributes {stable_mosaic.version = 11 : i64} {
  func.func @_conv_bn_relu_upsample_kernel(%arg0: i32, %arg1: i32, %arg2: i32, %arg3: memref<1x32x64xf32, #tpu.memory_space<vmem>>, %arg4: memref<1x32x1xf32, #tpu.memory_space<vmem>>, %arg5: memref<1x64x128xf32, #tpu.memory_space<vmem>>, %arg6: memref<1x128x1024xf32, #tpu.memory_space<vmem>>, %arg7: memref<1x1x32x1024xf32, #tpu.memory_space<vmem>>) attributes {dimension_semantics = [#tpu.dimension_semantics<parallel>, #tpu.dimension_semantics<parallel>, #tpu.dimension_semantics<parallel>], iteration_bounds = array<i64: 4, 1, 2>, scalar_prefetch = 0 : i64, scratch_operands = 0 : i64, tpu.core_type = #tpu.core_type<tc>, window_params = [{transform_indices = @transform_0, window_bounds = array<i64: 1, 32, 64>}, {transform_indices = @transform_1, window_bounds = array<i64: 1, 32, 1>}, {transform_indices = @transform_2, window_bounds = array<i64: 1, 64, 128>}, {transform_indices = @transform_3, window_bounds = array<i64: 1, 128, 1024>}, {transform_indices = @transform_4, window_bounds = array<i64: 1, 1, 32, 1024>}]} {
    %c0 = arith.constant 0 : index
    %c0_0 = arith.constant 0 : index
    %c0_1 = arith.constant 0 : index
    %0 = vector.load %arg3[%c0, %c0_0, %c0_1] : memref<1x32x64xf32, #tpu.memory_space<vmem>>, vector<1x32x64xf32>
    %1 = vector.shape_cast %0 : vector<1x32x64xf32> to vector<32x64xf32>
    %c0_2 = arith.constant 0 : index
    %c0_3 = arith.constant 0 : index
    %c0_4 = arith.constant 0 : index
    %2 = vector.load %arg5[%c0_2, %c0_3, %c0_4] : memref<1x64x128xf32, #tpu.memory_space<vmem>>, vector<1x64x128xf32>
    %3 = vector.shape_cast %2 : vector<1x64x128xf32> to vector<64x128xf32>
    %cst = arith.constant dense<0.000000e+00> : vector<32x128xf32>
    %4 = tpu.matmul %1, %3, %cst {dimension_numbers = #tpu.dot_dimension_numbers<[1], [0], [0], [1], [0, 0, 1, 1], [], []>} : vector<32x64xf32>, vector<64x128xf32>, vector<32x128xf32> -> vector<32x128xf32>
    %c0_5 = arith.constant 0 : index
    %c0_6 = arith.constant 0 : index
    %c0_7 = arith.constant 0 : index
    %5 = vector.load %arg4[%c0_5, %c0_6, %c0_7] : memref<1x32x1xf32, #tpu.memory_space<vmem>>, vector<1x32x1xf32>
    %6 = vector.shape_cast %5 : vector<1x32x1xf32> to vector<32x1xf32>
    %7 = vector.broadcast %6 : vector<32x1xf32> to vector<32x128xf32>
    %8 = arith.addf %4, %7 : vector<32x128xf32>
    %cst_8 = arith.constant 0.000000e+00 : f32
    %9 = vector.broadcast %cst_8 : f32 to vector<32x128xf32>
    %10 = arith.maximumf %8, %9 : vector<32x128xf32>
    %c0_9 = arith.constant 0 : index
    %c0_10 = arith.constant 0 : index
    %c0_11 = arith.constant 0 : index
    %11 = vector.load %arg6[%c0_9, %c0_10, %c0_11] : memref<1x128x1024xf32, #tpu.memory_space<vmem>>, vector<1x128x1024xf32>
    %12 = vector.shape_cast %11 : vector<1x128x1024xf32> to vector<128x1024xf32>
    %cst_12 = arith.constant dense<0.000000e+00> : vector<32x1024xf32>
    %13 = tpu.matmul %10, %12, %cst_12 {dimension_numbers = #tpu.dot_dimension_numbers<[1], [0], [0], [1], [0, 0, 1, 1], [], []>} : vector<32x128xf32>, vector<128x1024xf32>, vector<32x1024xf32> -> vector<32x1024xf32>
    %c0_13 = arith.constant 0 : index
    %c0_14 = arith.constant 0 : index
    %c0_15 = arith.constant 0 : index
    %c0_16 = arith.constant 0 : index
    %14 = vector.load %arg7[%c0_13, %c0_14, %c0_15, %c0_16] : memref<1x1x32x1024xf32, #tpu.memory_space<vmem>>, vector<1x1x32x1024xf32>
    %15 = vector.shape_cast %14 : vector<1x1x32x1024xf32> to vector<32x1024xf32>
    %16 = vector.shape_cast %13 : vector<32x1024xf32> to vector<1x1x32x1024xf32>
    tpu.vector_store %arg7[%c0_13, %c0_14, %c0_15, %c0_16], %16 {strides = array<i32>} : memref<1x1x32x1024xf32, #tpu.memory_space<vmem>>, vector<1x1x32x1024xf32>,
    return
  }
  func.func @transform_0(%arg0: i32, %arg1: i32, %arg2: i32) -> (i32, i32, i32) {
    %c0_i32 = arith.constant 0 : i32
    %c0_i32_0 = arith.constant 0 : i32
    return %arg0, %arg1, %c0_i32 : i32, i32, i32
  }
  func.func @transform_1(%arg0: i32, %arg1: i32, %arg2: i32) -> (i32, i32, i32) {
    %c0_i32 = arith.constant 0 : i32
    %c0_i32_0 = arith.constant 0 : i32
    return %arg0, %arg1, %c0_i32 : i32, i32, i32
  }
  func.func @transform_2(%arg0: i32, %arg1: i32, %arg2: i32) -> (i32, i32, i32) {
    %c0_i32 = arith.constant 0 : i32
    %c0_i32_0 = arith.constant 0 : i32
    %c0_i32_1 = arith.constant 0 : i32
    return %arg2, %c0_i32, %c0_i32_0 : i32, i32, i32
  }
  func.func @transform_3(%arg0: i32, %arg1: i32, %arg2: i32) -> (i32, i32, i32) {
    %c0_i32 = arith.constant 0 : i32
    %c0_i32_0 = arith.constant 0 : i32
    %c0_i32_1 = arith.constant 0 : i32
    return %arg0, %c0_i32, %c0_i32_0 : i32, i32, i32
  }
  func.func @transform_4(%arg0: i32, %arg1: i32, %arg2: i32) -> (i32, i32, i32, i32) {
    %c0_i32 = arith.constant 0 : i32
    %c0_i32_0 = arith.constant 0 : i32
    return %arg2, %arg0, %arg1, %c0_i32 : i32, i32, i32, i32
  }
}

</mosaic_0001>

<bundles_post_ra>
// kernel: pyramid_pool_forward.2
= control target key start
LH: loop header
LB: loop body
LE: loop exit
PB: predicated region body
PF: predicated region fallthrough
CT: control target
= control target key end

     0   :  { %7 = vsyncpa [#allocation3], 0  ;;  %s607_s0 = inlined_call_operand.hbm [shape: f32[128,256], index: 0, kind: input, shape index: {}]   ;;  %s608_s1 = inlined_call_operand.hbm [shape: f32[256,128], index: 1, kind: input, shape index: {}]   ;;  %s609_s2 = inlined_call_operand.hbm [shape: f32[128,128], index: 2, kind: output, shape index: {}]  }
   0x1   :  { %8 = vsyncpa [#allocation6], 0 }
   0x2   :  { %9 = vsyncpa [#allocation4], 0  ;;  %s543_s9 = smov [#allocation2]   ;;  %s471_s13 = scalar_lea.hbm %s607_s0, 4096 }
   0x3   :  { %s15_s10 = sshll.u32 %s543_s9, 4  ;;  %p472_p0 = scmp.ne.s32.totalorder %s607_s0, %s471_s13  ;;  %s16_s10 = int_to_ptr.vmem [resolvable:$true] %s15_s10 }
   0x4   :  { %p475_p1 = scmp.lt.u32.totalorder %s471_s13, %s607_s0 }
   0x6   :  { %p477_p2 = pnand %p475_p1, %p472_p0 }
   0x8   :  { %480 = shalt.err (!%p477_p2)
}
   0x9   :  { %s481_s18 = scalar_lea.vmem %s16_s10, 4096  ;;  %p486_p4 = scmp.lt.s32.totalorder %s16_s10, %s16_s10 }
   0xa   :  { %p482_p3 = scmp.ne.s32.totalorder %s16_s10, %s481_s18  ;;  %p487_p5 = scmp.lt.s32.totalorder %s481_s18, %s481_s18 }
   0xc   :  { %p488_p6 = por %p487_p5, %p486_p4 }
   0xe   :  { %p489_p7 = pnand %p488_p6, %p482_p3 }
  0x10   :  { %492 = shalt.err (!%p489_p7)
}
  0x11   :  { %s544_s19 = smov 256   ;;  %s545_s20 = smov 16  }
  0x12   :  { %21 = dma.hbm_to_vmem [thread:$0]  %s607_s0, 4096, %s16_s10, [#allocation3], %s544_s19, %s544_s19, %s545_s20  }
  0x13   :  { %s546_s23 = smov [#allocation5]   ;;  %s493_s27 = scalar_lea.hbm %s608_s1, 4096 }
  0x14   :  { %s27_s24 = sshll.u32 %s546_s23, 4  ;;  %p494_p8 = scmp.ne.s32.totalorder %s608_s1, %s493_s27  ;;  %s28_s24 = int_to_ptr.vmem [resolvable:$true] %s27_s24 }
  0x15   :  { %p497_p9 = scmp.lt.u32.totalorder %s493_s27, %s608_s1 }
  0x17   :  { %p499_p10 = pnand %p497_p9, %p494_p8 }
  0x19   :  { %502 = shalt.err (!%p499_p10)
}
  0x1a   :  { %s503_s4 = scalar_lea.vmem %s28_s24, 4096  ;;  %p508_p12 = scmp.lt.s32.totalorder %s28_s24, %s28_s24 }
  0x1b   :  { %p504_p11 = scmp.ne.s32.totalorder %s28_s24, %s503_s4  ;;  %p509_p13 = scmp.lt.s32.totalorder %s503_s4, %s503_s4 }
  0x1d   :  { %p510_p0 = por %p509_p13, %p508_p12 }
  0x1f   :  { %p511_p1 = pnand %p510_p0, %p504_p11 }
  0x21   :  { %514 = shalt.err (!%p511_p1)
}
  0x22   :  { %s547_s0 = smov 128   ;;  %s548_s5 = smov 8  }
  0x23   :  { %33 = dma.hbm_to_vmem [thread:$0]  %s608_s1, 4096, %s28_s24, [#allocation6], %s547_s0, %s547_s0, %s548_s5  }
  0x24   :  { %537 = dma.done.wait [#allocation3], 4096  }
  0x25   :  { %538 = vsyncadd [#allocation3], 4294963200 }
  0x26   :  { %539 = dma.done.wait [#allocation6], 4096  }
  0x27   :  { %540 = vsyncadd [#allocation6], 4294963200  ;;  %v124_v0 = vld [vmem:[#allocation5 + $0x80] sm:$0xff]  ;;  %v125_v1 = vld [vmem:[#allocation5 + $0x88] sm:$0xff]  ;;  %s549_s1 = smov [#allocation7]  }
  0x28   :  { %v108_v2 = vld [vmem:[#allocation5] sm:$0xff]  ;;  %v415_v3 = vpack.c.bf16 %v125_v1, %v124_v0  ;;  %v109_v4 = vld [vmem:[#allocation5 + $0x8] sm:$0xff]  ;;  %v126_v5 = vld [vmem:[#allocation5 + $0x90] sm:$0xff]  ;;  %s322_s8 = sshll.u32 %s549_s1, 4  ;;  %s323_s8 = int_to_ptr.vmem [resolvable:$true] %s322_s8 }
  0x29   :  { %v127_v6 = vld [vmem:[#allocation5 + $0x98] sm:$0xff]  ;;  %v417_v7 = vpack.c.bf16 %v109_v4, %v108_v2  ;;  %v110_v9 = vld [vmem:[#allocation5 + $0x10] sm:$0xff]  ;;  %v128_v11 = vld [vmem:[#allocation5 + $0xa0] sm:$0xff]  ;;  %s515_s9 = scalar_lea.vmem %s323_s8, 2048  ;;  %p520_p3 = scmp.lt.s32.totalorder %s323_s8, %s323_s8 }
  0x2a   :  { %v419_v8 = vpack.c.bf16 %v127_v6, %v126_v5  ;;  %v111_v10 = vld [vmem:[#allocation5 + $0x18] sm:$0xff]  ;;  %416 = vmatprep.subr.bf16.mxu0 %v415_v3  ;;  %447 = vmatprep.subr.bf16.mxu1 %v415_v3  ;;  %v129_v12 = vld [vmem:[#allocation5 + $0xa8] sm:$0xff]  ;;  %v112_v15 = vld [vmem:[#allocation5 + $0x20] sm:$0xff]  ;;  %p516_p2 = scmp.ne.s32.totalorder %s323_s8, %s515_s9  ;;  %p521_p4 = scmp.lt.s32.totalorder %s515_s9, %s515_s9 }
  0x2b   :  { %418 = vmatpush3.bf16.msra.mxu0 %v417_v7  ;;  %455 = vmatpush3.bf16.msra.mxu1 %v417_v7  ;;  %v421_v13 = vpack.c.bf16 %v111_v10, %v110_v9  ;;  %v423_v14 = vpack.c.bf16 %v129_v12, %v128_v11  ;;  %v113_v16 = vld [vmem:[#allocation5 + $0x28] sm:$0xff]  ;;  %v130_v17 = vld [vmem:[#allocation5 + $0xb0] sm:$0xff]  ;;  %v131_v18 = vld [vmem:[#allocation5 + $0xb8] sm:$0xff] }
  0x2c   :  { %420 = vmatprep.subr.bf16.mxu0 %v419_v8  ;;  %448 = vmatprep.subr.bf16.mxu1 %v419_v8  ;;  %v425_v19 = vpack.c.bf16 %v113_v16, %v112_v15  ;;  %v427_v20 = vpack.c.bf16 %v131_v18, %v130_v17  ;;  %v114_v21 = vld [vmem:[#allocation5 + $0x30] sm:$0xff]  ;;  %v115_v22 = vld [vmem:[#allocation5 + $0x38] sm:$0xff]  ;;  %v132_v23 = vld [vmem:[#allocation5 + $0xc0] sm:$0xff]  ;;  %p522_p5 = por %p521_p4, %p520_p3 }
  0x2d   :  { %v133_v24 = vld [vmem:[#allocation5 + $0xc8] sm:$0xff]  ;;  %v429_v27 = vpack.c.bf16 %v115_v22, %v114_v21  ;;  %v116_v29 = vld [vmem:[#allocation5 + $0x40] sm:$0xff]  ;;  %v134_v31 = vld [vmem:[#allocation5 + $0xd0] sm:$0xff] }
  0x2e   :  { %v77_v25 = vld [vmem:[#allocation2 + $0x8] sm:$0xff]  ;;  %v431_v28 = vpack.c.bf16 %v133_v24, %v132_v23  ;;  %v135_v32 = vld [vmem:[#allocation5 + $0xd8] sm:$0xff]  ;;  %v118_v35 = vld [vmem:[#allocation5 + $0x50] sm:$0xff]  ;;  %p523_p6 = pnand %p522_p5, %p516_p2 }
  0x2f   :  { %422 = vmatpush3.bf16.msra.mxu0 %v421_v13  ;;  %456 = vmatpush3.bf16.msra.mxu1 %v421_v13  ;;  %v93_v26 = vld [vmem:[#allocation2 + $0x88] sm:$0xff]  ;;  %v435_v34 = vpack.c.bf16 %v135_v32, %v134_v31  ;;  %v119_v36 = vld [vmem:[#allocation5 + $0x58] sm:$0xff]  ;;  %v136_v37 = vld [vmem:[#allocation5 + $0xe0] sm:$0xff] }
  0x30   :  { %424 = vmatprep.subr.bf16.mxu0 %v423_v14  ;;  %449 = vmatprep.subr.bf16.mxu1 %v423_v14  ;;  %v117_v30 = vld [vmem:[#allocation5 + $0x48] sm:$0xff]  ;;  %v437_v39 = vpack.c.bf16 %v119_v36, %v118_v35  ;;  %v120_v41 = vld [vmem:[#allocation5 + $0x60] sm:$0xff]  ;;  %v138_v43 = vld [vmem:[#allocation5 + $0xf0] sm:$0xff] }
  0x31   :  { %204 = vmatprep.mubr.f32.mxu0 %v77_v25  ;;  %244 = vmatprep.mubr.f32.mxu1 %v93_v26  ;;  %v433_v33 = vpack.c.bf16 %v117_v30, %v116_v29  ;;  %v137_v38 = vld [vmem:[#allocation5 + $0xe8] sm:$0xff]  ;;  %v139_v44 = vld [vmem:[#allocation5 + $0xf8] sm:$0xff]  ;;  %v122_v47 = vld [vmem:[#allocation5 + $0x70] sm:$0xff] }
  0x32   :  { %v439_v40 = vpack.c.bf16 %v137_v38, %v136_v37  ;;  %v121_v42 = vld [vmem:[#allocation5 + $0x68] sm:$0xff]  ;;  %v443_v46 = vpack.c.bf16 %v139_v44, %v138_v43  ;;  %v123_v48 = vld [vmem:[#allocation5 + $0x78] sm:$0xff]  ;;  %v76_v50 = vld [vmem:[#allocation2] sm:$0xff] }
  0x33   :  { %426 = vmatpush3.bf16.msra.mxu0 %v425_v19  ;;  %457 = vmatpush3.bf16.msra.mxu1 %v425_v19  ;;  %v441_v45 = vpack.c.bf16 %v121_v42, %v120_v41  ;;  %v445_v49 = vpack.c.bf16 %v123_v48, %v122_v47  ;;  %v92_v51 = vld [vmem:[#allocation2 + $0x80] sm:$0xff]  ;;  %v79_v52 = vld [vmem:[#allocation2 + $0x18] sm:$0xff]  ;;  %v78_v54 = vld [vmem:[#allocation2 + $0x10] sm:$0xff] }
  0x34   :  { %428 = vmatprep.subr.bf16.mxu0 %v427_v20  ;;  %450 = vmatprep.subr.bf16.mxu1 %v427_v20  ;;  %v95_v53 = vld [vmem:[#allocation2 + $0x98] sm:$0xff]  ;;  %v94_v55 = vld [vmem:[#allocation2 + $0x90] sm:$0xff]  ;;  %v81_v56 = vld [vmem:[#allocation2 + $0x28] sm:$0xff] }
  0x35   :  { %v97_v57 = vld [vmem:[#allocation2 + $0xa8] sm:$0xff]  ;;  %v80_v58 = vld [vmem:[#allocation2 + $0x20] sm:$0xff]  ;;  %v83_v60 = vld [vmem:[#allocation2 + $0x38] sm:$0xff] }
  0x36   :  { %v96_v59 = vld [vmem:[#allocation2 + $0xa0] sm:$0xff]  ;;  %v99_v61 = vld [vmem:[#allocation2 + $0xb8] sm:$0xff]  ;;  %v82_v62 = vld [vmem:[#allocation2 + $0x30] sm:$0xff] }
  0x37   :  { %430 = vmatpush3.bf16.msra.mxu0 %v429_v27  ;;  %458 = vmatpush3.bf16.msra.mxu1 %v429_v27  ;;  %v98_v63 = vld [vmem:[#allocation2 + $0xb0] sm:$0xff]  ;;  %v85_v0 = vld [vmem:[#allocation2 + $0x48] sm:$0xff]  ;;  %v84_v2 = vld [vmem:[#allocation2 + $0x40] sm:$0xff] }
  0x38   :  { %432 = vmatprep.subr.bf16.mxu0 %v431_v28  ;;  %451 = vmatprep.subr.bf16.mxu1 %v431_v28  ;;  %v101_v1 = vld [vmem:[#allocation2 + $0xc8] sm:$0xff]  ;;  %v100_v3 = vld [vmem:[#allocation2 + $0xc0] sm:$0xff]  ;;  %v87_v4 = vld [vmem:[#allocation2 + $0x58] sm:$0xff] }
  0x39   :  { %v103_v5 = vld [vmem:[#allocation2 + $0xd8] sm:$0xff]  ;;  %v86_v6 = vld [vmem:[#allocation2 + $0x50] sm:$0xff]  ;;  %v89_v8 = vld [vmem:[#allocation2 + $0x68] sm:$0xff] }
  0x3a   :  { %v102_v7 = vld [vmem:[#allocation2 + $0xd0] sm:$0xff]  ;;  %v105_v9 = vld [vmem:[#allocation2 + $0xe8] sm:$0xff]  ;;  %v88_v10 = vld [vmem:[#allocation2 + $0x60] sm:$0xff] }
  0x3b   :  { %434 = vmatpush3.bf16.msra.mxu0 %v433_v33  ;;  %459 = vmatpush3.bf16.msra.mxu1 %v433_v33  ;;  %v104_v11 = vld [vmem:[#allocation2 + $0xe0] sm:$0xff]  ;;  %v91_v12 = vld [vmem:[#allocation2 + $0x78] sm:$0xff]  ;;  %v90_v14 = vld [vmem:[#allocation2 + $0x70] sm:$0xff] }
  0x3c   :  { %436 = vmatprep.subr.bf16.mxu0 %v435_v34  ;;  %452 = vmatprep.subr.bf16.mxu1 %v435_v34  ;;  %v107_v13 = vld [vmem:[#allocation2 + $0xf8] sm:$0xff]  ;;  %v106_v15 = vld [vmem:[#allocation2 + $0xf0] sm:$0xff] }
  0x3f   :  { %438 = vmatpush3.bf16.msra.mxu0 %v437_v39  ;;  %460 = vmatpush3.bf16.msra.mxu1 %v437_v39 }
  0x40   :  { %440 = vmatprep.subr.bf16.mxu0 %v439_v40  ;;  %453 = vmatprep.subr.bf16.mxu1 %v439_v40 }
  0x43   :  { %442 = vmatpush3.bf16.msra.mxu0 %v441_v45  ;;  %461 = vmatpush3.bf16.msra.mxu1 %v441_v45 }
  0x44   :  { %444 = vmatprep.subr.bf16.mxu0 %v443_v46  ;;  %454 = vmatprep.subr.bf16.mxu1 %v443_v46 }
  0x47   :  { %446 = vmatpush3.bf16.msra.mxu0 %v445_v49  ;;  %462 = vmatpush3.bf16.msra.mxu1 %v445_v49 }
  0x4a   :  { %205 = vmatmul.mubr.f32.vlgmr.msra.gmra.mrb[0].mxu0 %v76_v50  ;;  %245 = vmatmul.mubr.f32.vlgmr.msra.gmra.mrb[0].mxu1 %v92_v51 }
  0x4b   :  { %209 = vmatprep.mubr.f32.mxu0 %v79_v52  ;;  %249 = vmatprep.mubr.f32.mxu1 %v95_v53 }
  0x4e   :  { %210 = vmatmul.mubr.f32.gmra.mrb[2].mxu0 %v78_v54  ;;  %250 = vmatmul.mubr.f32.gmra.mrb[2].mxu1 %v94_v55 }
  0x4f   :  { %214 = vmatprep.mubr.f32.mxu0 %v81_v56  ;;  %254 = vmatprep.mubr.f32.mxu1 %v97_v57 }
  0x52   :  { %215 = vmatmul.mubr.f32.gmra.mrb[4].mxu0 %v80_v58  ;;  %255 = vmatmul.mubr.f32.gmra.mrb[4].mxu1 %v96_v59 }
  0x53   :  { %219 = vmatprep.mubr.f32.mxu0 %v83_v60  ;;  %259 = vmatprep.mubr.f32.mxu1 %v99_v61 }
  0x56   :  { %220 = vmatmul.mubr.f32.gmra.mrb[6].mxu0 %v82_v62  ;;  %260 = vmatmul.mubr.f32.gmra.mrb[6].mxu1 %v98_v63 }
  0x57   :  { %224 = vmatprep.mubr.f32.mxu0 %v85_v0  ;;  %264 = vmatprep.mubr.f32.mxu1 %v101_v1 }
  0x5a   :  { %225 = vmatmul.mubr.f32.gmra.mrb[8].mxu0 %v84_v2  ;;  %265 = vmatmul.mubr.f32.gmra.mrb[8].mxu1 %v100_v3 }
  0x5b   :  { %229 = vmatprep.mubr.f32.mxu0 %v87_v4  ;;  %269 = vmatprep.mubr.f32.mxu1 %v103_v5 }
  0x5e   :  { %230 = vmatmul.mubr.f32.gmra.mrb[10].mxu0 %v86_v6  ;;  %270 = vmatmul.mubr.f32.gmra.mrb[10].mxu1 %v102_v7 }
  0x5f   :  { %234 = vmatprep.mubr.f32.mxu0 %v89_v8  ;;  %274 = vmatprep.mubr.f32.mxu1 %v105_v9 }
  0x62   :  { %235 = vmatmul.mubr.f32.gmra.mrb[12].mxu0 %v88_v10  ;;  %275 = vmatmul.mubr.f32.gmra.mrb[12].mxu1 %v104_v11 }
  0x63   :  { %239 = vmatprep.mubr.f32.mxu0 %v91_v12  ;;  %279 = vmatprep.mubr.f32.mxu1 %v107_v13 }
  0x66   :  { %240 = vmatmul.mubr.f32.gmra.mrb[14].mxu0 %v90_v14  ;;  %280 = vmatmul.mubr.f32.gmra.mrb[14].mxu1 %v106_v15 }
 0x11d   :  { %v367_v16 = vpop.f32.mrb[0].mxu0  ;;  %v391_v17 = vpop.f32.mrb[0].mxu1 }
 0x11e   :  { %v368_v18 = vpop.f32.mrb[1].mxu0  ;;  %v392_v19 = vpop.f32.mrb[1].mxu1 }
 0x11f   :  { %v369_v20 = vadd.f32 %v368_v18, %v367_v16  ;;  %v393_v21 = vadd.f32 %v392_v19, %v391_v17 }
 0x121   :  { %v370_v22 = vpop.f32.mrb[2].mxu0  ;;  %v394_v23 = vpop.f32.mrb[2].mxu1  ;;  %301 = vst [vmem:[#allocation7] sm:$0xff] %v369_v20  ;;  %309 = vst [vmem:[#allocation7 + $0x40] sm:$0xff] %v393_v21 }
 0x122   :  { %v371_v24 = vpop.f32.mrb[3].mxu0  ;;  %v395_v25 = vpop.f32.mrb[3].mxu1 }
 0x123   :  { %v372_v26 = vadd.f32 %v371_v24, %v370_v22  ;;  %v396_v27 = vadd.f32 %v395_v25, %v394_v23 }
 0x125   :  { %v373_v28 = vpop.f32.mrb[4].mxu0  ;;  %v397_v29 = vpop.f32.mrb[4].mxu1  ;;  %302 = vst [vmem:[#allocation7 + $0x8] sm:$0xff] %v372_v26  ;;  %310 = vst [vmem:[#allocation7 + $0x48] sm:$0xff] %v396_v27 }
 0x126   :  { %v374_v30 = vpop.f32.mrb[5].mxu0  ;;  %v398_v31 = vpop.f32.mrb[5].mxu1 }
 0x127   :  { %v375_v32 = vadd.f32 %v374_v30, %v373_v28  ;;  %v399_v33 = vadd.f32 %v398_v31, %v397_v29 }
 0x129   :  { %v376_v34 = vpop.f32.mrb[6].mxu0  ;;  %v400_v35 = vpop.f32.mrb[6].mxu1  ;;  %303 = vst [vmem:[#allocation7 + $0x10] sm:$0xff] %v375_v32  ;;  %311 = vst [vmem:[#allocation7 + $0x50] sm:$0xff] %v399_v33 }
 0x12a   :  { %v377_v36 = vpop.f32.mrb[7].mxu0  ;;  %v401_v37 = vpop.f32.mrb[7].mxu1 }
 0x12b   :  { %v378_v38 = vadd.f32 %v377_v36, %v376_v34  ;;  %v402_v39 = vadd.f32 %v401_v37, %v400_v35 }
 0x12d   :  { %v379_v40 = vpop.f32.mrb[8].mxu0  ;;  %v403_v41 = vpop.f32.mrb[8].mxu1  ;;  %304 = vst [vmem:[#allocation7 + $0x18] sm:$0xff] %v378_v38  ;;  %312 = vst [vmem:[#allocation7 + $0x58] sm:$0xff] %v402_v39 }
 0x12e   :  { %v380_v42 = vpop.f32.mrb[9].mxu0  ;;  %v404_v43 = vpop.f32.mrb[9].mxu1 }
 0x12f   :  { %v381_v44 = vadd.f32 %v380_v42, %v379_v40  ;;  %v405_v45 = vadd.f32 %v404_v43, %v403_v41 }
 0x131   :  { %v382_v46 = vpop.f32.mrb[10].mxu0  ;;  %v406_v47 = vpop.f32.mrb[10].mxu1  ;;  %305 = vst [vmem:[#allocation7 + $0x20] sm:$0xff] %v381_v44  ;;  %313 = vst [vmem:[#allocation7 + $0x60] sm:$0xff] %v405_v45 }
 0x132   :  { %v383_v48 = vpop.f32.mrb[11].mxu0  ;;  %v407_v49 = vpop.f32.mrb[11].mxu1 }
 0x133   :  { %v384_v50 = vadd.f32 %v383_v48, %v382_v46  ;;  %v408_v51 = vadd.f32 %v407_v49, %v406_v47 }
 0x135   :  { %v385_v52 = vpop.f32.mrb[12].mxu0  ;;  %v409_v53 = vpop.f32.mrb[12].mxu1  ;;  %306 = vst [vmem:[#allocation7 + $0x28] sm:$0xff] %v384_v50  ;;  %314 = vst [vmem:[#allocation7 + $0x68] sm:$0xff] %v408_v51 }
 0x136   :  { %v386_v54 = vpop.f32.mrb[13].mxu0  ;;  %v410_v55 = vpop.f32.mrb[13].mxu1 }
 0x137   :  { %v387_v56 = vadd.f32 %v386_v54, %v385_v52  ;;  %v411_v57 = vadd.f32 %v410_v55, %v409_v53 }
 0x139   :  { %v388_v58 = vpop.f32.mrb[14].mxu0  ;;  %v412_v59 = vpop.f32.mrb[14].mxu1  ;;  %307 = vst [vmem:[#allocation7 + $0x30] sm:$0xff] %v387_v56  ;;  %315 = vst [vmem:[#allocation7 + $0x70] sm:$0xff] %v411_v57 }
 0x13a   :  { %v389_v60 = vpop.f32.mrb[15].mxu0  ;;  %v413_v61 = vpop.f32.mrb[15].mxu1 }
 0x13b   :  { %v390_v62 = vadd.f32 %v389_v60, %v388_v58  ;;  %v414_v63 = vadd.f32 %v413_v61, %v412_v59 }
 0x13d   :  { %308 = vst [vmem:[#allocation7 + $0x38] sm:$0xff] %v390_v62  ;;  %316 = vst [vmem:[#allocation7 + $0x78] sm:$0xff] %v414_v63 }
 0x13e   :  { %526 = shalt.err (!%p523_p6)
}
 0x13f   :  { %s527_s12 = scalar_lea.hbm %s609_s2, 2048 }
 0x140   :  { %p528_p7 = scmp.ne.s32.totalorder %s609_s2, %s527_s12  ;;  %p531_p8 = scmp.lt.u32.totalorder %s527_s12, %s609_s2 }
 0x142   :  { %p533_p9 = pnand %p531_p8, %p528_p7 }
 0x144   :  { %536 = shalt.err (!%p533_p9)
}
 0x145   :  { %328 = dma.vmem_to_hbm [thread:$0]  %s323_s8, 2048, %s609_s2, [#allocation4], %s547_s0, %s547_s0, %s548_s5  }
 0x146   :  { %541 = dma.done.wait [#allocation4], 2048  }
 0x147   :  { %542 = vsyncadd [#allocation4], 4294965248 }
 0x148   :  { %332 = vsyncpa [#allocation3], 1 }
 0x149   :  { %333 = vsyncpa [#allocation6], 1 }
 0x14a   :  { %334 = vsyncpa [#allocation4], 1 }

// kernel: pyramid_pool_forward.3
= control target key start
LH: loop header
LB: loop body
LE: loop exit
PB: predicated region body
PF: predicated region fallthrough
CT: control target
= control target key end

     0   :  { %s2556_s0 = inlined_call_operand.hbm [shape: f32[4,32,64], index: 0, kind: input, shape index: {}]   ;;  %s2557_s1 = inlined_call_operand.hbm [shape: f32[4,32,1], index: 1, kind: input, shape index: {}]   ;;  %s2558_s2 = inlined_call_operand.hbm [shape: f32[2,64,128], index: 2, kind: input, shape index: {}]   ;;  %s2559_s3 = inlined_call_operand.hbm [shape: f32[4,128,1024], index: 3, kind: input, shape index: {}]   ;;  %s2560_s4 = inlined_call_operand.hbm [shape: f32[2,4,32,1024], index: 4, kind: output, shape index: {}]  }
   0x1   :  { %2588 = sst [smem:[#allocation29_spill]] %s2556_s0 }
   0x2   :  { %2589 = sst [smem:[#allocation30_spill]] %s2557_s1 }
   0x3   :  { %2590 = sst [smem:[#allocation31_spill]] %s2560_s4 }
   0x4   :  { %9 = vsyncpa [#allocation3], 0 }
   0x5   :  { %11 = vsyncpa [#allocation3 + $0x1], 0 }
   0x6   :  { %12 = vsyncpa [#allocation6], 0 }
   0x7   :  { %14 = vsyncpa [#allocation6 + $0x1], 0 }
   0x8   :  { %15 = vsyncpa [#allocation9], 0 }
   0x9   :  { %17 = vsyncpa [#allocation9 + $0x1], 0 }
   0xa   :  { %18 = vsyncpa [#allocation4], 0 }
   0xb   :  { %20 = vsyncpa [#allocation4 + $0x1], 0  ;;  %s1887_s15 = smov 0   ;;  %s1889_s16 = smov 0  }
   0xc   :  { %s1891_s17 = smov 0   ;;  %s1893_s18 = smov 0  }
   0xd   :  { %s1895_s19 = smov 0   ;;  %s1897_s20 = smov 0  }
   0xe   :  { %s1899_s21 = smov 0   ;;  %s1901_s22 = smov 0  }
   0xf   :  { %s1903_s23 = smov 0   ;;  %s1905_s24 = smov 0  }
  0x10   :  { %s1907_s25 = smov 0   ;;  %s1909_s26 = smov 0  }
  0x11   :  { %s1911_s27 = smov 0   ;;  %s1913_s28 = smov 0  }
  0x12 LB: > { %2591 = sst [smem:[#allocation16_spill]] %s1811_s19  ;;  %s1956_s29 = sadd.s32 4294967295, %s1847_s28   ;;  %s1847_s28 = sphi %s1913_s28, %s26_s28   ;;  %s1843_s27 = sphi %s1911_s27, %s2661_s27   ;;  %s1839_s26 = sphi %s1909_s26, %s2660_s26   ;;  %s1835_s25 = sphi %s1907_s25, %s2659_s25   ;;  %s1831_s24 = sphi %s1905_s24, %s2658_s24   ;;  %s1827_s23 = sphi %s1903_s23, %s2657_s23   ;;  %s1823_s22 = sphi %s1901_s22, %s2656_s22   ;;  %s1819_s21 = sphi %s1899_s21, %s2646_s21   ;;  %s1815_s20 = sphi %s1897_s20, %s2655_s20   ;;  %s1811_s19 = sphi %s1895_s19, %s2654_s19   ;;  %s1807_s18 = sphi %s1893_s18, %s2644_s18   ;;  %s1803_s17 = sphi %s1891_s17, %s2653_s17   ;;  %s1799_s16 = sphi %s1889_s16, %s2652_s16   ;;  %s1795_s15 = sphi %s1887_s15, %s2651_s15  }
  0x13   : > { %2592 = sst [smem:[#allocation17_spill]] %s1823_s22  ;;  %p61_p0 = scmp.ne.s32.totalorder %s1827_s23, %s1823_s22 }
  0x14   : > { %2593 = sst [smem:[#allocation18_spill]] %s1831_s24  ;;  %p2566_p1 = scmp.eq.s32.totalorder %s1847_s28, 0 }
  0x15   : > { %2594 = sst [smem:[#allocation19_spill]] %s1835_s25  ;;  %p67_p2 = scmp.ne.s32.totalorder %s1823_s22, %s1819_s21 }
  0x16   : > { %2595 = sst [smem:[#allocation20_spill]] %s1956_s29  ;;  %p2565_p3 = scmp.eq.s32.totalorder %s1956_s29, 0 }
  0x17   : > { %p63_p5 = por %p2566_p1, %p61_p0  ;;  %p2564_p7 = scmp.lt.s32.totalorder %s1847_s28, 8 }
  0x18   : > { %p1970_p6 = por %p2565_p3, %p67_p2  ;;  %s1976_s7 = sand.u32 1, %s1827_s23  }
  0x19   : > { %s2563_s8 = sshll.u32 %s1843_s27, 9  ;;  %s2562_s9 = sshll.u32 %s1976_s7, 5 }
  0x1a   : > { %s2596_s6 = scalar_select %p1970_p6, 1, 0 }
  0x1b   : > { %p1982_p8 = pnand %p2564_p7, %p63_p5  ;;  %s224_s11 = sand.u32 1, %s1847_s28  }
  0x1c   : > { %2597 = sst [smem:[#allocation21_spill]] %s2596_s6  ;;  %s2600_s1 = sld [smem:[#allocation30_spill]] }
  0x1d   : > { %s2598_s10 = scalar_select %p1982_p8, 1, 0 }
  0x1e   : > { %s228_s21 = scalar_lea.vmem [#allocation5], %s2562_s9  ;;  %s1999_s30 = scalar_lea.sflag [#allocation6], %s224_s11 }
  0x1f   : > { %2599 = sst [smem:[#allocation22_spill]] %s2598_s10  ;;  %s237_s5 = sshll.u32 %s228_s21, 4  ;;  %s1996_s5 = int_to_ptr.vmem [resolvable:$true] %s237_s5 }
  0x20   : > { %p2005_p11 = pneg %p1982_p8 }
  0x22   : > { %s1992_s14 = scalar_lea.hbm %s2600_s1, %s2563_s8  ;;  %s1574_s21 = scalar_lea.hbm %s2600_s1, 2048 }
  0x23   : > { %s1569_s4 = scalar_lea.hbm %s1992_s14, 512  ;;  %p1575_p0 = scmp.lt.u32.totalorder %s1992_s14, %s2600_s1 }
  0x24   : > { %p1570_p10 = scmp.ne.s32.totalorder %s1992_s14, %s1569_s4  ;;  %p1576_p2 = scmp.lt.u32.totalorder %s1574_s21, %s1569_s4 }
  0x25   : > { %p1578_p7 = scmp.lt.u32.totalorder %s1569_s4, %s1992_s14 }
  0x26   : > { %p1572_p12 = pnand %p2005_p11, %p1570_p10  ;;  %p1577_p5 = por %p1576_p2, %p1575_p0 }
  0x28   : > { %p1573_p13 = pneg %p1572_p12  ;;  %p1579_p4 = por %p1578_p7, %p1577_p5 }
  0x2a   : > { %p1580_p3 = pnand %p1579_p4, %p1573_p13 }
  0x2c   : > { %1583 = shalt.err (!%p1580_p3)
}
  0x2d   : > { %s1584_s11 = scalar_lea.vmem %s1996_s5, 512  ;;  %s1849_s12 = smov [#allocation5]  }
  0x2e   : > { %p1585_p10 = scmp.ne.s32.totalorder %s1996_s5, %s1584_s11  ;;  %s1589_s13 = sshll.u32 %s1849_s12, 4  ;;  %s1590_s13 = int_to_ptr.vmem [resolvable:$false] %s1589_s13 }
  0x2f   : > { %s1591_s8 = scalar_lea.vmem %s1590_s13, 1024  ;;  %p1592_p9 = scmp.lt.s32.totalorder %s1996_s5, %s1590_s13 }
  0x30   : > { %p1587_p12 = pnand %p1585_p10, %p2005_p11  ;;  %p1593_p6 = scmp.lt.s32.totalorder %s1591_s8, %s1584_s11 }
  0x32   : > { %p1588_p1 = pneg %p1587_p12  ;;  %p1594_p0 = por %p1593_p6, %p1592_p9 }
  0x34   : > { %p1595_p2 = pnand %p1594_p0, %p1588_p1 }
  0x36   : > { %1598 = shalt.err (!%p1595_p2)
}
  0x37   : > { %s2570_s4 = smov 128   ;;  %s2572_s9 = smov 8  }
  0x38   : > { %1434 = dma.hbm_to_vmem [thread:$0]  (!%p1982_p8), %s1992_s14, 512, %s1996_s5, %s1999_s30, %s2570_s4, %s2570_s4, %s2572_s9  }
  0x39   : > { %p287_p3 = scmp.lt.s32.totalorder %s1847_s28, 9  ;;  %p2602_p1 = scmp.ge.s32.totalorder %s1847_s28, 1 }
  0x3a   : > { %s2605_s11 = sshll.u32 %s1843_s27, 9  ;;  %s2606_s0 = sld [smem:[#allocation29_spill]] }
  0x3b   : > { %p2035_p4 = pnand %p2602_p1, %p287_p3  ;;  %s2607_s1 = sshll.u32 %s1976_s7, 5 }
  0x3c   : > { %s205_s25 = scalar_lea.vmem [#allocation2], %s2607_s1  ;;  %s202_s5 = scalar_lea.sflag [#allocation3], %s1976_s7 }
  0x3d   : > { %s2603_s21 = scalar_select %p2035_p4, 1, 0 }
  0x3e   : > { %s214_s6 = sshll.u32 %s205_s25, 4  ;;  %s2048_s6 = int_to_ptr.vmem [resolvable:$true] %s214_s6 }
  0x3f   : > { %2604 = sst [smem:[#allocation23_spill]] %s2603_s21 }
  0x40   : > { %s2044_s8 = scalar_lea.hbm %s2606_s0, %s2605_s11  ;;  %s1604_s11 = scalar_lea.hbm %s2606_s0, 2048 }
  0x41   : > { %s1599_s14 = scalar_lea.hbm %s2044_s8, 512  ;;  %p1605_p13 = scmp.lt.u32.totalorder %s2044_s8, %s2606_s0 }
  0x42   : > { %p1600_p6 = scmp.ne.s32.totalorder %s2044_s8, %s1599_s14  ;;  %p1606_p5 = scmp.lt.u32.totalorder %s1604_s11, %s1599_s14 }
  0x43   : > { %p1608_p12 = scmp.lt.u32.totalorder %s1599_s14, %s2044_s8 }
  0x44   : > { %p1602_p7 = pnand %p1600_p6, %p2005_p11  ;;  %p1607_p10 = por %p1606_p5, %p1605_p13 }
  0x46   : > { %p1603_p9 = pneg %p1602_p7  ;;  %p1609_p0 = por %p1608_p12, %p1607_p10 }
  0x48   : > { %p1610_p2 = pnand %p1609_p0, %p1603_p9 }
  0x4a   : > { %1613 = shalt.err (!%p1610_p2)
}
  0x4b   : > { %s1614_s1 = scalar_lea.vmem %s2048_s6, 512  ;;  %s1852_s25 = smov [#allocation2]  }
  0x4c   : > { %p1615_p3 = scmp.ne.s32.totalorder %s2048_s6, %s1614_s1  ;;  %s1619_s4 = sshll.u32 %s1852_s25, 4  ;;  %s1620_s4 = int_to_ptr.vmem [resolvable:$false] %s1619_s4 }
  0x4d   : > { %s1621_s9 = scalar_lea.vmem %s1620_s4, 1024  ;;  %p1622_p7 = scmp.lt.s32.totalorder %s2048_s6, %s1620_s4 }
  0x4e   : > { %p1617_p1 = pnand %p1615_p3, %p2005_p11  ;;  %p1623_p4 = scmp.lt.s32.totalorder %s1621_s9, %s1614_s1 }
  0x50   : > { %p1618_p6 = pneg %p1617_p1  ;;  %p1624_p13 = por %p1623_p4, %p1622_p7 }
  0x52   : > { %p1625_p5 = pnand %p1624_p13, %p1618_p6 }
  0x54   : > { %1628 = shalt.err (!%p1625_p5)
}
  0x55   : > { %s2608_s14 = smov 8   ;;  %s2609_s11 = smov 128  }
  0x56   : > { %1431 = dma.hbm_to_vmem [thread:$0]  (!%p1982_p8), %s2044_s8, 512, %s2048_s6, %s202_s5, %s2609_s11, %s2609_s11, %s2608_s14  }
  0x57   : > { %s1205_s12 = sadd.s32 4294967294, %s1847_s28   ;;  %s38_s13 = sadd.s32 1, %s1839_s26 }
  0x58   : > { %s108_s1 = sadd.s32 1, %s1815_s20  ;;  %p39_p4 = scmp.ge.s32.totalorder %s38_s13, 2 }
  0x59   : > { %p115_p9 = scmp.ne.s32.totalorder %s1815_s20, %s1811_s19  ;;  %p121_p10 = scmp.ne.s32.totalorder %s1811_s19, %s1807_s18 }
  0x5a   : > { %s164_s25 = sadd.s32 1, %s1803_s17  ;;  %s2663_s13 = smov (%p39_p4, %s38_s13), 0 }
  0x5b   : > { %2610 = sst [smem:[#allocation24_spill]] %s2663_s13  ;;  %s2611_s4 = sadd.s32 1, %s1843_s27 }
  0x5c   : > { %s2665_s4 = smov (!%p39_p4, %s2611_s4), %s1843_s27  ;;  %s105_s6 = ssub.s32 %s1839_s26, %s2663_s13 }
  0x5d   : > { %p2612_p12 = scmp.eq.s32.totalorder %s1847_s28, 0  ;;  %p47_p2 = scmp.ge.s32.totalorder %s2665_s4, 4 }
  0x5e   : > { %p106_p3 = scmp.eq.s32.totalorder %s105_s6, 0  ;;  %p2614_p1 = scmp.eq.s32.totalorder %s1956_s29, 0 }
  0x5f   : > { %p2094_p0 = por %p115_p9, %p2612_p12  ;;  %p174_p7 = scmp.ne.s32.totalorder %s1803_s17, %s1799_s16 }
  0x60   : > { %p2100_p6 = por %p121_p10, %p2614_p1  ;;  %s2667_s4 = smov (%p47_p2, %s2665_s4), 0 }
  0x61   : > { %2617 = sst [smem:[#allocation26_spill]] %s2667_s4  ;;  %s49_s9 = ssub.s32 %s1843_s27, %s2667_s4 }
  0x62   : > { %s2615_s18 = scalar_select %p2100_p6, 1, 0 }
  0x63   : > { %s2109_s5 = scalar_select %p106_p3, %s1815_s20, %s108_s1  }
  0x64   : > { %2616 = sst [smem:[#allocation25_spill]] %s2615_s18  ;;  %p2619_p13 = scmp.eq.s32.totalorder %s1956_s29, 7 }
  0x65   : > { %2618 = sst [smem:[#allocation27_spill]] %s2109_s5  ;;  %p52_p4 = scmp.eq.s32.totalorder %s49_s9, 0 }
  0x66   : > { %p2115_p5 = por %p2619_p13, %p174_p7  ;;  %s159_s13 = sor.u32 %s105_s6, %s49_s9 }
  0x67   : > { %p162_p9 = scmp.eq.s32.totalorder %s159_s13, 0  ;;  %p180_p10 = scmp.ne.s32.totalorder %s1799_s16, %s1795_s15 }
  0x68   : > { %s2620_s0 = scalar_select %p2115_p5, 1, 0 }
  0x69   : > { %s2622_s18 = sadd.s32 1, %s1827_s23  ;;  %p181_p12 = scmp.eq.s32.totalorder %s1205_s12, 7 }
  0x6a   : > { %2621 = sst [smem:[#allocation28_spill]] %s2620_s0  ;;  %s249_s1 = sand.u32 1, %s1815_s20  }
  0x6b   : > { %s2124_s19 = scalar_select %p52_p4, %s1827_s23, %s2622_s18  }
  0x6c   : > { %s2127_s22 = scalar_select %p162_p9, %s1803_s17, %s164_s25  }
  0x6d   : > { %s1214_s4 = sshll.u32 %s249_s1, 6  ;;  %s1238_s5 = sshll.u32 %s1839_s26, 10 }
  0x6e   : > { %p2131_p2 = por %p181_p12, %p180_p10  ;;  %s2138_s10 = scalar_lea.hbm %s2558_s2, %s1238_s5 }
  0x6f   : > { %s251_s13 = scalar_lea.vmem [#allocation7], %s1214_s4  ;;  %p2624_p3 = scmp.lt.s32.totalorder %s1847_s28, 8 }
  0x70   : > { %s2623_s29 = scalar_select %p2131_p2, 1, 0 }
  0x71   : > { %s258_s25 = sshll.u32 %s251_s13, 4  ;;  %p2146_p1 = pnand %p2624_p3, %p2094_p0  ;;  %s2140_s25 = int_to_ptr.vmem [resolvable:$true] %s258_s25 }
  0x72   : > { %s1217_s6 = sshll.u32 %s1976_s7, 10  ;;  %s1629_s0 = scalar_lea.hbm %s2138_s10, 1024 }
  0x73   : > { %p1630_p7 = scmp.ne.s32.totalorder %s2138_s10, %s1629_s0  ;;  %p1631_p13 = pneg %p2146_p1 }
  0x74   : > { %s1634_s8 = scalar_lea.hbm %s2558_s2, 2048  ;;  %p1635_p0 = scmp.lt.u32.totalorder %s2138_s10, %s2558_s2 }
  0x75   : > { %p1632_p4 = pnand %p1631_p13, %p1630_p7  ;;  %p1636_p10 = scmp.lt.u32.totalorder %s1634_s8, %s1629_s0 }
  0x76   : > { %p1638_p3 = scmp.lt.u32.totalorder %s1629_s0, %s2138_s10 }
  0x77   : > { %p1633_p9 = pneg %p1632_p4  ;;  %p1637_p12 = por %p1636_p10, %p1635_p0 }
  0x79   : > { %p1639_p2 = por %p1638_p3, %p1637_p12 }
  0x7b   : > { %p1640_p5 = pnand %p1639_p2, %p1633_p9 }
  0x7d   : > { %1643 = shalt.err (!%p1640_p5)
}
  0x7e   : > { %s1644_s9 = scalar_lea.vmem %s2140_s25, 1024  ;;  %s1853_s1 = smov [#allocation7]  }
  0x7f   : > { %p1645_p7 = scmp.ne.s32.totalorder %s2140_s25, %s1644_s9  ;;  %s1649_s13 = sshll.u32 %s1853_s1, 4  ;;  %s1650_s13 = int_to_ptr.vmem [resolvable:$false] %s1649_s13 }
  0x80   : > { %s1651_s21 = scalar_lea.vmem %s1650_s13, 2048  ;;  %p1652_p8 = scmp.lt.s32.totalorder %s2140_s25, %s1650_s13 }
  0x81   : > { %p1647_p4 = pnand %p1645_p7, %p1631_p13  ;;  %p1653_p0 = scmp.lt.s32.totalorder %s1651_s21, %s1644_s9 }
  0x83   : > { %p1648_p6 = pneg %p1647_p4  ;;  %p1654_p10 = por %p1653_p0, %p1652_p8 }
  0x85   : > { %p1655_p12 = pnand %p1654_p10, %p1648_p6 }
  0x87   : > { %1658 = shalt.err (!%p1655_p12)
}
  0x88   : > { %1437 = dma.hbm_to_vmem [thread:$0]  (!%p2146_p1), %s2138_s10, 1024, %s2140_s25, %s1999_s30, %s2609_s11, %s2609_s11, %s2608_s14  }
  0x89   : > { %s1239_s0 = sshll.u32 %s1843_s27, 14  ;;  %s272_s4 = scalar_lea.vmem [#allocation8], %s1217_s6 }
  0x8a   : > { %s279_s8 = sshll.u32 %s272_s4, 4  ;;  %s2186_s9 = scalar_lea.hbm %s2559_s3, %s1239_s0  ;;  %s2188_s8 = int_to_ptr.vmem [resolvable:$true] %s279_s8 }
  0x8b   : > { %s269_s12 = scalar_lea.sflag [#allocation9], %s1976_s7  ;;  %s1659_s1 = scalar_lea.hbm %s2186_s9, 16384 }
  0x8c   : > { %p1660_p8 = scmp.ne.s32.totalorder %s2186_s9, %s1659_s1  ;;  %s1664_s14 = scalar_lea.hbm %s2559_s3, 65536 }
  0x8d   : > { %p1665_p2 = scmp.lt.u32.totalorder %s2186_s9, %s2559_s3  ;;  %p1666_p1 = scmp.lt.u32.totalorder %s1664_s14, %s1659_s1 }
  0x8e   : > { %p1662_p6 = pnand %p1660_p8, %p2005_p11  ;;  %p1668_p9 = scmp.lt.u32.totalorder %s1659_s1, %s2186_s9 }
  0x8f   : > { %p1667_p13 = por %p1666_p1, %p1665_p2 }
  0x90   : > { %p1663_p5 = pneg %p1662_p6 }
  0x91   : > { %p1669_p3 = por %p1668_p9, %p1667_p13 }
  0x93   : > { %p1670_p7 = pnand %p1669_p3, %p1663_p5 }
  0x95   : > { %1673 = shalt.err (!%p1670_p7)
}
  0x96   : > { %s1674_s6 = scalar_lea.vmem %s2188_s8, 16384  ;;  %s1854_s13 = smov [#allocation8]  }
  0x97   : > { %p1675_p4 = scmp.ne.s32.totalorder %s2188_s8, %s1674_s6  ;;  %s1679_s21 = sshll.u32 %s1854_s13, 4  ;;  %s1680_s21 = int_to_ptr.vmem [resolvable:$false] %s1679_s21 }
  0x98   : > { %s1681_s0 = scalar_lea.vmem %s1680_s21, 32768  ;;  %p1682_p12 = scmp.lt.s32.totalorder %s2188_s8, %s1680_s21 }
  0x99   : > { %p1677_p0 = pnand %p1675_p4, %p2005_p11  ;;  %p1683_p8 = scmp.lt.s32.totalorder %s1681_s0, %s1674_s6 }
  0x9b   : > { %p1678_p10 = pneg %p1677_p0  ;;  %p1684_p6 = por %p1683_p8, %p1682_p12 }
  0x9d   : > { %p1685_p2 = pnand %p1684_p6, %p1678_p10 }
  0x9f   : > { %1688 = shalt.err (!%p1685_p2)
}
  0xa0   : > { %s1855_s4 = smov 1024   ;;  %s2626_s18 = sld [smem:[#allocation22_spill]] }
  0xa1   : > { %s1856_s5 = smov 64   ;;  %s2628_s24 = sld [smem:[#allocation23_spill]] }
  0xa6   : > { %p2627_p5 = scmp.ne.s32.totalorder %s2626_s18, 0 }
  0xa7   : > { %p2629_p11 = scmp.ne.s32.totalorder %s2628_s24, 0 }
  0xa8   : > { %1440 = dma.hbm_to_vmem [thread:$0]  (!%p2627_p5), %s2186_s9, 16384, %s2188_s8, %s269_s12, %s1855_s4, %s1855_s4, %s1856_s5  }
  0xa9   : > { %291 = sbr.rel (%p2629_p11) target bundleno = 710 (0x2c6), region = 36  ;;  %s2630_s1 = sld [smem:[#allocation17_spill]] (!%p2629_p11) }
  0xaa   : > { %s2631_s30 = sld [smem:[#allocation21_spill]] (!%p2629_p11) }
  0xaf   : > { %s293_s10 = sand.u32 (!%p2629_p11), 1, %s2630_s1  }
  0xb0   : > { %s1221_s14 = sshll.u32 %s293_s10, 5  ;;  %s294_s11 = scalar_lea.sflag [#allocation3], %s293_s10 }
  0xb1   : > { %s2217_s25 = scalar_lea.vmem [#allocation2], %s1221_s14  ;;  %p2632_p1 = scmp.ne.s32.totalorder %s2631_s30, 0 }
  0xb3   : > { %1774 = dma.done.wait (%p2632_p1), %s294_s11, 512  }
  0xb4   : > { %1776 = vsyncadd (%p2632_p1), %s294_s11, 4294966784  ;;  %s2633_s6 = sld [smem:[#allocation20_spill]]  ;;  %s2224_s8 = scalar_lea.vmem [#allocation5], %s1221_s14 }
  0xba   : > { %s302_s13 = sand.u32 1, %s2633_s6  }
  0xbb   : > { %s303_s7 = scalar_lea.sflag [#allocation6], %s302_s13 }
  0xbc   : > { %1778 = dma.done.wait (%p2632_p1), %s303_s7, 512  }
  0xbd   : > { %1780 = vsyncadd (%p2632_p1), %s303_s7, 4294966784  ;;  %s2634_s9 = sld [smem:[#allocation16_spill]]  ;;  %s2635_s12 = sld [smem:[#allocation25_spill]] }
  0xc3   : > { %s313_s21 = sand.u32 1, %s2634_s9   ;;  %p2636_p13 = scmp.ne.s32.totalorder %s2635_s12, 0 }
  0xc4   : > { %s1223_s0 = sshll.u32 %s313_s21, 6 }
  0xc5   : > { %s2231_s4 = scalar_lea.vmem [#allocation7], %s1223_s0 }
  0xc6   : > { %1782 = dma.done.wait (%p2636_p13), %s303_s7, 1024  }
  0xc7   : > { %1784 = vsyncadd (%p2636_p13), %s303_s7, 4294966272  ;;  %s1224_s18 = sshll.u32 %s293_s10, 10  ;;  %s321_s5 = scalar_lea.sflag [#allocation9], %s293_s10 }
  0xc8   : > { %s2237_s24 = scalar_lea.vmem [#allocation8], %s1224_s18 }
  0xc9   : > { %1786 = dma.done.wait (%p2632_p1), %s321_s5, 16384  }
  0xca   : > { %1788 = vsyncadd (%p2632_p1), %s321_s5, 4294950912  ;;  %v1857_v0 = vmov 0   ;;  %v371_v1 = vld [vmem:[%s2231_s4] sm:$0xff]  ;;  %v372_v2 = vld [vmem:[%s2231_s4 + $0x8] sm:$0xff]  ;;  %vm403_vm0 = vcmask 523264   ;;  %s361_s1 = sand.u32 1, %s1799_s16  }
  0xcb   : > { %1567 = vset.pattern.permute.xlu0 %v1857_v0  ;;  %1568 = vset.pattern.permute.xlu1 %v1857_v0  ;;  %v373_v3 = vld [vmem:[%s2231_s4 + $0x10] sm:$0xff]  ;;  %v1274_v4 = vpack.c.bf16 %v372_v2, %v371_v1  ;;  %v374_v5 = vld [vmem:[%s2231_s4 + $0x18] sm:$0xff]  ;;  %v375_v7 = vld [vmem:[%s2231_s4 + $0x20] sm:$0xff]  ;;  %s1225_s30 = sshll.u32 %s361_s1, 8  ;;  %s2637_s14 = sld [smem:[#allocation19_spill]] }
  0xcc   : > { %v1278_v6 = vpack.c.bf16 %v374_v5, %v373_v3  ;;  %v376_v8 = vld [vmem:[%s2231_s4 + $0x28] sm:$0xff]  ;;  %v367_v9 = vld [vmem:[%s2217_s25] sm:$0xff]  ;;  %v381_v11 = vld [vmem:[%s2224_s8 + $0x10] sm:$0xff]  ;;  %s2434_s10 = scalar_lea.vmem [#allocation10], %s1225_s30  ;;  %s2638_s11 = sld [smem:[#allocation18_spill]] }
  0xcd   : > { %1275 = vmatprep.subr.bf16.mxu0 %v1274_v4  ;;  %1268 = vmatprep.mubr.msk.f32.mxu0 %vm403_vm0, %v367_v9  ;;  %v379_v10 = vld [vmem:[%s2224_s8] sm:$0xff]  ;;  %v1282_v12 = vpack.c.bf16 %v376_v8, %v375_v7  ;;  %v377_v13 = vld [vmem:[%s2231_s4 + $0x30] sm:$0xff]  ;;  %v506_v14 = vld [vmem:[%s2237_s24 + $0x8] sm:$0xff]  ;;  %s2639_s9 = sld [smem:[#allocation28_spill]]  ;;  %s2640_s0 = sld [smem:[#allocation31_spill]] }
  0xce   : > { %1277 = vmatpush3.bf16.msra.mxu0 %v1274_v4  ;;  %385 = vperm.xlu0 %1567, %v379_v10   ;;  %v514_v15 = vld [vmem:[%s2237_s24 + $0x48] sm:$0xff]  ;;  %v378_v16 = vld [vmem:[%s2231_s4 + $0x38] sm:$0xff]  ;;  %v505_v19 = vld [vmem:[%s2237_s24] sm:$0xff]  ;;  %s2480_s18 = scalar_lea.sflag [#allocation4], %s361_s1 }
  0xcf   : > { %1279 = vmatprep.subr.bf16.mxu0 %v1278_v6  ;;  %v380_v17 = vld [vmem:[%s2224_s8 + $0x8] sm:$0xff]  ;;  %395 = vperm.xlu1 %1568, %v381_v11   ;;  %v1290_v18 = vpack.c.bf16 %v514_v15, %v506_v14  ;;  %v382_v20 = vld [vmem:[%s2224_s8 + $0x18] sm:$0xff]  ;;  %v513_v21 = vld [vmem:[%s2237_s24 + $0x40] sm:$0xff]  ;;  %v1286_v25 = vpack.c.bf16 %v378_v16, %v377_v13  ;;  %s1040_s8 = sshll.u32 %s2434_s10, 4  ;;  %s2472_s8 = int_to_ptr.vmem [resolvable:$true] %s1040_s8 }
  0xd0   : > { %v1292_v22 = vpack.c.bf16 %v513_v21, %v505_v19  ;;  %v522_v23 = vld [vmem:[%s2237_s24 + $0x88] sm:$0xff]  ;;  %v521_v27 = vld [vmem:[%s2237_s24 + $0x80] sm:$0xff]  ;;  %v508_v29 = vld [vmem:[%s2237_s24 + $0x18] sm:$0xff]  ;;  %s1689_s5 = scalar_lea.vmem %s2472_s8, 4096 }
  0xd1   : > { %1291 = vmatprep.subr.bf16.mxu1 %v1290_v18  ;;  %v530_v24 = vld [vmem:[%s2237_s24 + $0xc8] sm:$0xff]  ;;  %v529_v28 = vld [vmem:[%s2237_s24 + $0xc0] sm:$0xff]  ;;  %v516_v30 = vld [vmem:[%s2237_s24 + $0x58] sm:$0xff]  ;;  %p1690_p9 = scmp.ne.s32.totalorder %s2472_s8, %s1689_s5 }
  0xd2   : > { %1281 = vmatpush3.bf16.msra.mxu0 %v1278_v6  ;;  %390 = vperm.xlu0 %1567, %v380_v17   ;;  %v1294_v26 = vpack.c.bf16 %v530_v24, %v522_v23  ;;  %v1296_v31 = vpack.c.bf16 %v529_v28, %v521_v27  ;;  %v538_v32 = vld [vmem:[%s2237_s24 + $0x108] sm:$0xff]  ;;  %v507_v34 = vld [vmem:[%s2237_s24 + $0x10] sm:$0xff]  ;;  %v537_v36 = vld [vmem:[%s2237_s24 + $0x100] sm:$0xff]  ;;  %v1322_v38 = vpack.c.bf16 %v516_v30, %v508_v29  ;;  %s1232_s6 = sshll.u32 %s2638_s11, 7 }
  0xd3   : > { %1283 = vmatprep.subr.bf16.mxu0 %v1282_v12  ;;  %400 = vperm.xlu1 %1568, %v382_v20   ;;  %v546_v33 = vld [vmem:[%s2237_s24 + $0x148] sm:$0xff]  ;;  %v545_v37 = vld [vmem:[%s2237_s24 + $0x140] sm:$0xff]  ;;  %v515_v39 = vld [vmem:[%s2237_s24 + $0x50] sm:$0xff]  ;;  %p2641_p3 = scmp.ne.s32.totalorder %s2639_s9, 0 }
  0xd4   : > { %1293 = vmatpush1.bf16.msra.mxu1 %v1292_v22  ;;  %v1298_v35 = vpack.c.bf16 %v546_v33, %v538_v32  ;;  %v554_v40 = vld [vmem:[%s2237_s24 + $0x188] sm:$0xff]  ;;  %v524_v42 = vld [vmem:[%s2237_s24 + $0x98] sm:$0xff]  ;;  %v1300_v44 = vpack.c.bf16 %v545_v37, %v537_v36  ;;  %v553_v46 = vld [vmem:[%s2237_s24 + $0x180] sm:$0xff]  ;;  %v1324_v49 = vpack.c.bf16 %v515_v39, %v507_v34 }
  0xd5   : > { %1295 = vmatprep.subr.bf16.mxu1 %v1294_v26  ;;  %v562_v41 = vld [vmem:[%s2237_s24 + $0x1c8] sm:$0xff]  ;;  %v532_v43 = vld [vmem:[%s2237_s24 + $0xd8] sm:$0xff]  ;;  %v561_v47 = vld [vmem:[%s2237_s24 + $0x1c0] sm:$0xff]  ;;  %p1691_p7 = pnand %p1690_p9, %p2641_p3 }
  0xd6   : > { %1285 = vmatpush3.bf16.msra.mxu0 %v1282_v12  ;;  %v1302_v45 = vpack.c.bf16 %v562_v41, %v554_v40  ;;  %v368_v48 = vld [vmem:[%s2217_s25 + $0x8] sm:$0xff]  ;;  %v369_v52 = vld [vmem:[%s2217_s25 + $0x10] sm:$0xff]  ;;  %v1326_v53 = vpack.c.bf16 %v532_v43, %v524_v42  ;;  %v540_v56 = vld [vmem:[%s2237_s24 + $0x118] sm:$0xff]  ;;  %v1304_v58 = vpack.c.bf16 %v561_v47, %v553_v46 }
  0xd7   : > { %1287 = vmatprep.subr.bf16.mxu0 %v1286_v25  ;;  %v570_v50 = vld [vmem:[%s2237_s24 + $0x208] sm:$0xff]  ;;  %v523_v54 = vld [vmem:[%s2237_s24 + $0x90] sm:$0xff]  ;;  %v548_v57 = vld [vmem:[%s2237_s24 + $0x158] sm:$0xff]  ;;  %p1692_p4 = pneg %p1691_p7 }
  0xd8   : > { %1297 = vmatpush1.bf16.msra.mxu1 %v1296_v31  ;;  %v578_v51 = vld [vmem:[%s2237_s24 + $0x248] sm:$0xff]  ;;  %v531_v55 = vld [vmem:[%s2237_s24 + $0xd0] sm:$0xff]  ;;  %v569_v60 = vld [vmem:[%s2237_s24 + $0x200] sm:$0xff]  ;;  %v1330_v2 = vpack.c.bf16 %v548_v57, %v540_v56 }
  0xd9   : > { %1299 = vmatprep.subr.bf16.mxu1 %v1298_v35  ;;  %v1306_v59 = vpack.c.bf16 %v578_v51, %v570_v50  ;;  %v577_v61 = vld [vmem:[%s2237_s24 + $0x240] sm:$0xff]  ;;  %v370_v62 = vld [vmem:[%s2217_s25 + $0x18] sm:$0xff]  ;;  %v1328_v63 = vpack.c.bf16 %v531_v55, %v523_v54  ;;  %v586_v0 = vld [vmem:[%s2237_s24 + $0x288] sm:$0xff]  ;;  %s1231_s25 = sshll.u32 %s2637_s14, 5 }
  0xda   : > { %1289 = vmatpush3.bf16.msra.mxu0 %v1286_v25  ;;  %v594_v1 = vld [vmem:[%s2237_s24 + $0x2c8] sm:$0xff]  ;;  %v539_v3 = vld [vmem:[%s2237_s24 + $0x110] sm:$0xff]  ;;  %v556_v5 = vld [vmem:[%s2237_s24 + $0x198] sm:$0xff]  ;;  %v1308_v7 = vpack.c.bf16 %v577_v61, %v569_v60  ;;  %s1037_s13 = sadd.s32 %s1232_s6, %s1231_s25 }
  0xdb   : > { %1323 = vmatprep.subr.bf16.mxu0 %v1322_v38  ;;  %v547_v4 = vld [vmem:[%s2237_s24 + $0x150] sm:$0xff]  ;;  %v564_v6 = vld [vmem:[%s2237_s24 + $0x1d8] sm:$0xff]  ;;  %v1310_v8 = vpack.c.bf16 %v594_v1, %v586_v0  ;;  %v585_v9 = vld [vmem:[%s2237_s24 + $0x280] sm:$0xff]  ;;  %s1233_s7 = sshll.u32 %s1037_s13, 7 }
  0xdc   : > { %1301 = vmatpush1.bf16.msra.mxu1 %v1300_v44  ;;  %v593_v10 = vld [vmem:[%s2237_s24 + $0x2c0] sm:$0xff]  ;;  %v1332_v11 = vpack.c.bf16 %v547_v4, %v539_v3  ;;  %v602_v12 = vld [vmem:[%s2237_s24 + $0x308] sm:$0xff]  ;;  %v1334_v14 = vpack.c.bf16 %v564_v6, %v556_v5  ;;  %v555_v15 = vld [vmem:[%s2237_s24 + $0x190] sm:$0xff]  ;;  %s2470_s4 = scalar_lea.hbm %s2640_s0, %s1233_s7 }
  0xdd   : > { %1269 = vmatmul.mubr.msk.f32.vlgmr.msra.gmra.mrb[0].mxu0 %vm403_vm0, %v368_v48  ;;  %1303 = vmatprep.subr.bf16.mxu1 %v1302_v45  ;;  %v610_v13 = vld [vmem:[%s2237_s24 + $0x348] sm:$0xff]  ;;  %v563_v16 = vld [vmem:[%s2237_s24 + $0x1d0] sm:$0xff]  ;;  %v572_v17 = vld [vmem:[%s2237_s24 + $0x218] sm:$0xff]  ;;  %v1312_v19 = vpack.c.bf16 %v593_v10, %v585_v9 }
  0xde   : > { %1271 = vmatprep.mubr.msk.f32.mxu0 %vm403_vm0, %v369_v52  ;;  %1325 = vmatpush1.bf16.msra.mxu0 %v1324_v49  ;;  %v580_v18 = vld [vmem:[%s2237_s24 + $0x258] sm:$0xff]  ;;  %v1314_v20 = vpack.c.bf16 %v610_v13, %v602_v12  ;;  %v601_v21 = vld [vmem:[%s2237_s24 + $0x300] sm:$0xff]  ;;  %v1336_v23 = vpack.c.bf16 %v563_v16, %v555_v15  ;;  %v571_v25 = vld [vmem:[%s2237_s24 + $0x210] sm:$0xff] }
  0xdf   : > { %1327 = vmatprep.subr.bf16.mxu0 %v1326_v53  ;;  %v609_v22 = vld [vmem:[%s2237_s24 + $0x340] sm:$0xff]  ;;  %v1338_v24 = vpack.c.bf16 %v580_v18, %v572_v17  ;;  %v579_v26 = vld [vmem:[%s2237_s24 + $0x250] sm:$0xff]  ;;  %v588_v27 = vld [vmem:[%s2237_s24 + $0x298] sm:$0xff] }
  0xe0   : > { %1305 = vmatpush1.bf16.msra.mxu1 %v1304_v58  ;;  %v596_v28 = vld [vmem:[%s2237_s24 + $0x2d8] sm:$0xff]  ;;  %v1316_v29 = vpack.c.bf16 %v609_v22, %v601_v21  ;;  %v1340_v30 = vpack.c.bf16 %v579_v26, %v571_v25  ;;  %v587_v32 = vld [vmem:[%s2237_s24 + $0x290] sm:$0xff]  ;;  %v618_v41 = vld [vmem:[%s2237_s24 + $0x388] sm:$0xff] }
  0xe1   : > { %1272 = vmatmul.mubr.msk.f32.gmra.mrb[2].mxu0 %vm403_vm0, %v370_v62  ;;  %1307 = vmatprep.subr.bf16.mxu1 %v1306_v59  ;;  %v1342_v31 = vpack.c.bf16 %v596_v28, %v588_v27  ;;  %v595_v33 = vld [vmem:[%s2237_s24 + $0x2d0] sm:$0xff]  ;;  %v604_v34 = vld [vmem:[%s2237_s24 + $0x318] sm:$0xff]  ;;  %v626_v42 = vld [vmem:[%s2237_s24 + $0x3c8] sm:$0xff]  ;;  %v1858_v59 = vmov 0.0  }
  0xe2   : > { %1329 = vmatpush1.bf16.msra.mxu0 %v1328_v63  ;;  %v612_v35 = vld [vmem:[%s2237_s24 + $0x358] sm:$0xff]  ;;  %v1344_v36 = vpack.c.bf16 %v595_v33, %v587_v32  ;;  %v603_v38 = vld [vmem:[%s2237_s24 + $0x310] sm:$0xff]  ;;  %v1318_v44 = vpack.c.bf16 %v626_v42, %v618_v41  ;;  %v617_v46 = vld [vmem:[%s2237_s24 + $0x380] sm:$0xff]  ;;  %697 = vmatprep.mubr.f32.mxu1 %v1858_v59 }
  0xe3   : > { %1331 = vmatprep.subr.bf16.mxu0 %v1330_v2  ;;  %v1346_v37 = vpack.c.bf16 %v612_v35, %v604_v34  ;;  %v611_v39 = vld [vmem:[%s2237_s24 + $0x350] sm:$0xff]  ;;  %v620_v43 = vld [vmem:[%s2237_s24 + $0x398] sm:$0xff]  ;;  %v625_v47 = vld [vmem:[%s2237_s24 + $0x3c0] sm:$0xff]  ;;  %786 = vmatprep.mubr.f32.mxu0 %v1858_v59 }
  0xe4   : > { %1309 = vmatpush1.bf16.msra.mxu1 %v1308_v7  ;;  %v1348_v40 = vpack.c.bf16 %v611_v39, %v603_v38  ;;  %v628_v45 = vld [vmem:[%s2237_s24 + $0x3d8] sm:$0xff]  ;;  %v1320_v49 = vpack.c.bf16 %v625_v47, %v617_v46  ;;  %v619_v50 = vld [vmem:[%s2237_s24 + $0x390] sm:$0xff]  ;;  %v510_v53 = vld [vmem:[%s2237_s24 + $0x28] sm:$0xff] }
  0xe5   : > { %1311 = vmatprep.subr.bf16.mxu1 %v1310_v8  ;;  %v1350_v48 = vpack.c.bf16 %v628_v45, %v620_v43  ;;  %v627_v51 = vld [vmem:[%s2237_s24 + $0x3d0] sm:$0xff]  ;;  %v518_v54 = vld [vmem:[%s2237_s24 + $0x68] sm:$0xff]  ;;  %v512_v55 = vld [vmem:[%s2237_s24 + $0x38] sm:$0xff] }
  0xe6   : > { %1333 = vmatpush1.bf16.msra.mxu0 %v1332_v11  ;;  %v1352_v52 = vpack.c.bf16 %v627_v51, %v619_v50  ;;  %v1354_v56 = vpack.c.bf16 %v518_v54, %v510_v53  ;;  %v520_v57 = vld [vmem:[%s2237_s24 + $0x78] sm:$0xff]  ;;  %v509_v61 = vld [vmem:[%s2237_s24 + $0x20] sm:$0xff]  ;;  %v511_v0 = vld [vmem:[%s2237_s24 + $0x30] sm:$0xff] }
  0xe7   : > { %1335 = vmatprep.subr.bf16.mxu0 %v1334_v14  ;;  %v1386_v58 = vpack.c.bf16 %v520_v57, %v512_v55  ;;  %v517_v63 = vld [vmem:[%s2237_s24 + $0x60] sm:$0xff]  ;;  %v519_v1 = vld [vmem:[%s2237_s24 + $0x70] sm:$0xff]  ;;  %v526_v5 = vld [vmem:[%s2237_s24 + $0xa8] sm:$0xff] }
  0xe8   : > { %1313 = vmatpush1.bf16.msra.mxu1 %v1312_v19  ;;  %v534_v7 = vld [vmem:[%s2237_s24 + $0xe8] sm:$0xff]  ;;  %v528_v8 = vld [vmem:[%s2237_s24 + $0xb8] sm:$0xff]  ;;  %v1356_v10 = vpack.c.bf16 %v517_v63, %v509_v61  ;;  %v1388_v11 = vpack.c.bf16 %v519_v1, %v511_v0  ;;  %v525_v12 = vld [vmem:[%s2237_s24 + $0xa0] sm:$0xff] }
  0xe9   : > { %1315 = vmatprep.subr.bf16.mxu1 %v1314_v20  ;;  %v536_v9 = vld [vmem:[%s2237_s24 + $0xf8] sm:$0xff]  ;;  %v533_v13 = vld [vmem:[%s2237_s24 + $0xe0] sm:$0xff]  ;;  %v527_v16 = vld [vmem:[%s2237_s24 + $0xb0] sm:$0xff]  ;;  %v1358_v20 = vpack.c.bf16 %v534_v7, %v526_v5 }
  0xea   : > { %1337 = vmatpush1.bf16.msra.mxu0 %v1336_v23  ;;  %v535_v17 = vld [vmem:[%s2237_s24 + $0xf0] sm:$0xff]  ;;  %v542_v18 = vld [vmem:[%s2237_s24 + $0x128] sm:$0xff]  ;;  %v1390_v21 = vpack.c.bf16 %v536_v9, %v528_v8  ;;  %v544_v23 = vld [vmem:[%s2237_s24 + $0x138] sm:$0xff]  ;;  %v1360_v27 = vpack.c.bf16 %v533_v13, %v525_v12 }
  0xeb   : > { %1339 = vmatprep.subr.bf16.mxu0 %v1338_v24  ;;  %v550_v22 = vld [vmem:[%s2237_s24 + $0x168] sm:$0xff]  ;;  %v552_v24 = vld [vmem:[%s2237_s24 + $0x178] sm:$0xff]  ;;  %v1392_v28 = vpack.c.bf16 %v535_v17, %v527_v16  ;;  %v543_v35 = vld [vmem:[%s2237_s24 + $0x130] sm:$0xff] }
  0xec   : > { %1317 = vmatpush1.bf16.msra.mxu1 %v1316_v29  ;;  %v541_v29 = vld [vmem:[%s2237_s24 + $0x120] sm:$0xff]  ;;  %v1362_v33 = vpack.c.bf16 %v550_v22, %v542_v18  ;;  %v1394_v34 = vpack.c.bf16 %v552_v24, %v544_v23  ;;  %v566_v38 = vld [vmem:[%s2237_s24 + $0x1e8] sm:$0xff]  ;;  %v560_v39 = vld [vmem:[%s2237_s24 + $0x1b8] sm:$0xff] }
  0xed   : > { %1319 = vmatprep.subr.bf16.mxu1 %v1318_v44  ;;  %v557_v45 = vld [vmem:[%s2237_s24 + $0x1a0] sm:$0xff]  ;;  %v567_v50 = vld [vmem:[%s2237_s24 + $0x1f0] sm:$0xff]  ;;  %v574_v51 = vld [vmem:[%s2237_s24 + $0x228] sm:$0xff] }
  0xee   : > { %1341 = vmatpush1.bf16.msra.mxu0 %v1340_v30  ;;  %v549_v30 = vld [vmem:[%s2237_s24 + $0x160] sm:$0xff]  ;;  %v576_v53 = vld [vmem:[%s2237_s24 + $0x238] sm:$0xff]  ;;  %v575_v63 = vld [vmem:[%s2237_s24 + $0x230] sm:$0xff] }
  0xef   : > { %1343 = vmatprep.subr.bf16.mxu0 %v1342_v31  ;;  %v1364_v43 = vpack.c.bf16 %v549_v30, %v541_v29  ;;  %v565_v46 = vld [vmem:[%s2237_s24 + $0x1e0] sm:$0xff]  ;;  %v584_v54 = vld [vmem:[%s2237_s24 + $0x278] sm:$0xff]  ;;  %v583_v0 = vld [vmem:[%s2237_s24 + $0x270] sm:$0xff] }
  0xf0   : > { %1321 = vmatpush1.bf16.msra.mxu1 %v1320_v49  ;;  %v559_v49 = vld [vmem:[%s2237_s24 + $0x1b0] sm:$0xff]  ;;  %v590_v1 = vld [vmem:[%s2237_s24 + $0x2a8] sm:$0xff]  ;;  %v589_v7 = vld [vmem:[%s2237_s24 + $0x2a0] sm:$0xff] }
  0xf1   : > { %1355 = vmatprep.subr.bf16.mxu1 %v1354_v56  ;;  %v1368_v56 = vpack.c.bf16 %v565_v46, %v557_v45  ;;  %v1400_v57 = vpack.c.bf16 %v567_v50, %v559_v49  ;;  %v597_v8 = vld [vmem:[%s2237_s24 + $0x2e0] sm:$0xff]  ;;  %v599_v12 = vld [vmem:[%s2237_s24 + $0x2f0] sm:$0xff]  ;;  %v606_v13 = vld [vmem:[%s2237_s24 + $0x328] sm:$0xff] }
  0xf2   : > { %1345 = vmatpush1.bf16.msra.mxu0 %v1344_v36  ;;  %v551_v36 = vld [vmem:[%s2237_s24 + $0x170] sm:$0xff]  ;;  %v608_v16 = vld [vmem:[%s2237_s24 + $0x338] sm:$0xff]  ;;  %v1376_v18 = vpack.c.bf16 %v597_v8, %v589_v7 }
  0xf3   : > { %1347 = vmatprep.subr.bf16.mxu0 %v1346_v37  ;;  %v558_v37 = vld [vmem:[%s2237_s24 + $0x1a8] sm:$0xff]  ;;  %v1396_v44 = vpack.c.bf16 %v551_v36, %v543_v35  ;;  %v616_v17 = vld [vmem:[%s2237_s24 + $0x378] sm:$0xff]  ;;  %v607_v24 = vld [vmem:[%s2237_s24 + $0x330] sm:$0xff] }
  0xf4   : > { %v1366_v47 = vpack.c.bf16 %v566_v38, %v558_v37  ;;  %v1410_v23 = vpack.c.bf16 %v616_v17, %v608_v16  ;;  %v632_v29 = vld [vmem:[%s2237_s24 + $0x3f8] sm:$0xff]  ;;  %v629_v36 = vld [vmem:[%s2237_s24 + $0x3e0] sm:$0xff]  ;;  %v623_v37 = vld [vmem:[%s2237_s24 + $0x3b0] sm:$0xff] }
  0xf5   : > { %v631_v38 = vld [vmem:[%s2237_s24 + $0x3f0] sm:$0xff] }
  0xf6   : > { %1349 = vmatpush1.bf16.msra.mxu0 %v1348_v40  ;;  %v568_v40 = vld [vmem:[%s2237_s24 + $0x1f8] sm:$0xff] }
  0xf7   : > { %1351 = vmatprep.subr.bf16.mxu0 %v1350_v48  ;;  %v1398_v48 = vpack.c.bf16 %v568_v40, %v560_v39  ;;  %v1416_v40 = vpack.c.bf16 %v631_v38, %v623_v37 }
  0xfa   : > { %1353 = vmatpush1.bf16.msra.mxu0 %v1352_v52  ;;  %v582_v52 = vld [vmem:[%s2237_s24 + $0x268] sm:$0xff] }
  0xfb   : > { %1387 = vmatprep.subr.bf16.mxu0 %v1386_v58  ;;  %v573_v58 = vld [vmem:[%s2237_s24 + $0x220] sm:$0xff]  ;;  %v1370_v61 = vpack.c.bf16 %v582_v52, %v574_v51 }
 0x14d   : > { %v386_v60 = vpop.permute.xlu0 %385 }
 0x14e   : > { %v396_v2 = vpop.permute.xlu1 %395 }
 0x151   : > { %v391_v3 = vpop.permute.xlu0 %390 }
 0x152   : > { %v401_v31 = vpop.permute.xlu1 %400 }
 0x1b0   : > { %v1270_v62 = vpop.f32.mrb[0].mxu0 }
 0x1b1   : > { %v482_v4 = vpop.f32.mrb[1].mxu0  ;;  %v488_v14 = vadd.f32 %v1270_v62, %v391_v3  ;;  %v1402_v62 = vpack.c.bf16 %v584_v54, %v576_v53  ;;  %v592_v3 = vld [vmem:[%s2237_s24 + $0x2b8] sm:$0xff] }
 0x1b2   : > { %v483_v6 = vadd.f32 %v482_v4, %v386_v60  ;;  %v581_v60 = vld [vmem:[%s2237_s24 + $0x260] sm:$0xff]  ;;  %v600_v4 = vld [vmem:[%s2237_s24 + $0x2f8] sm:$0xff] }
 0x1b3   : > { %v2355_v32 = vmax.f32 %v488_v14, 0.0  ;;  %v1372_v5 = vpack.c.bf16 %v581_v60, %v573_v58  ;;  %v614_v14 = vld [vmem:[%s2237_s24 + $0x368] sm:$0xff] }
 0x1b4   : > { %v2343_v15 = vmax.f32 %v483_v6, 0.0  ;;  %v1273_v19 = vpop.f32.mrb[2].mxu0  ;;  %v1404_v6 = vpack.c.bf16 %v583_v0, %v575_v63  ;;  %v1378_v22 = vpack.c.bf16 %v614_v14, %v606_v13 }
 0x1b5   : > { %v492_v25 = vpop.f32.mrb[3].mxu0  ;;  %v498_v42 = vadd.f32 %v1273_v19, %v401_v31 }
 0x1b6   : > { %698 = vmatmul.mubr.f32.vlgmr.msra.gmra.mrb[0].mxu1 %v2343_v15  ;;  %787 = vmatmul.mubr.f32.vlgmr.msra.gmra.mrb[4].mxu0 %v2343_v15  ;;  %v493_v26 = vadd.f32 %v492_v25, %v396_v2  ;;  %v598_v2 = vld [vmem:[%s2237_s24 + $0x2e8] sm:$0xff]  ;;  %v615_v25 = vld [vmem:[%s2237_s24 + $0x370] sm:$0xff] }
 0x1b7   : > { %1357 = vmatpush1.bf16.msra.mxu1 %v1356_v10  ;;  %1389 = vmatpush1.bf16.msra.mxu0 %v1388_v11  ;;  %v2379_v55 = vmax.f32 %v498_v42, 0.0  ;;  %v1374_v9 = vpack.c.bf16 %v598_v2, %v590_v1  ;;  %v1406_v10 = vpack.c.bf16 %v600_v4, %v592_v3  ;;  %v591_v11 = vld [vmem:[%s2237_s24 + $0x2b0] sm:$0xff]  ;;  %v1412_v31 = vpack.c.bf16 %v615_v25, %v607_v24 }
 0x1b8   : > { %703 = vmatprep.mubr.f32.mxu1 %v1858_v59  ;;  %792 = vmatprep.mubr.f32.mxu0 %v1858_v59  ;;  %v2367_v41 = vmax.f32 %v493_v26, 0.0  ;;  %v1408_v19 = vpack.c.bf16 %v599_v12, %v591_v11  ;;  %v622_v26 = vld [vmem:[%s2237_s24 + $0x3a8] sm:$0xff] }
 0x1b9   : > { %1359 = vmatprep.subr.bf16.mxu1 %v1358_v20  ;;  %1391 = vmatprep.subr.bf16.mxu0 %v1390_v21  ;;  %v605_v20 = vld [vmem:[%s2237_s24 + $0x320] sm:$0xff] }
 0x1ba   : > { %704 = vmatmul.mubr.f32.gmra.mrb[2].mxu1 %v2355_v32  ;;  %793 = vmatmul.mubr.f32.gmra.mrb[6].mxu0 %v2355_v32  ;;  %v613_v21 = vld [vmem:[%s2237_s24 + $0x360] sm:$0xff] }
 0x1bb   : > { %1361 = vmatpush1.bf16.msra.mxu1 %v1360_v27  ;;  %1393 = vmatpush1.bf16.msra.mxu0 %v1392_v28  ;;  %v630_v27 = vld [vmem:[%s2237_s24 + $0x3e8] sm:$0xff]  ;;  %v624_v28 = vld [vmem:[%s2237_s24 + $0x3b8] sm:$0xff]  ;;  %v1380_v30 = vpack.c.bf16 %v613_v21, %v605_v20 }
 0x1bc   : > { %1363 = vmatprep.subr.bf16.mxu1 %v1362_v33  ;;  %1395 = vmatprep.subr.bf16.mxu0 %v1394_v34  ;;  %v621_v33 = vld [vmem:[%s2237_s24 + $0x3a0] sm:$0xff]  ;;  %v1382_v34 = vpack.c.bf16 %v630_v27, %v622_v26  ;;  %v1414_v35 = vpack.c.bf16 %v632_v29, %v624_v28  ;;  %s1859_s24 = smov [#allocation10]  }
 0x1bd   : > { %709 = vmatprep.mubr.f32.mxu1 %v1858_v59  ;;  %798 = vmatprep.mubr.f32.mxu0 %v1858_v59  ;;  %v1384_v39 = vpack.c.bf16 %v629_v36, %v621_v33  ;;  %s1693_s30 = sshll.u32 %s1859_s24, 4  ;;  %s1694_s30 = int_to_ptr.vmem [resolvable:$false] %s1693_s30 }
 0x1be   : > { %710 = vmatmul.mubr.f32.gmra.mrb[4].mxu1 %v2367_v41  ;;  %799 = vmatmul.mubr.f32.gmra.mrb[8].mxu0 %v2367_v41  ;;  %s1695_s14 = scalar_lea.vmem %s1694_s30, 8192  ;;  %p1696_p0 = scmp.lt.s32.totalorder %s2472_s8, %s1694_s30 }
 0x1bf   : > { %1365 = vmatpush1.bf16.msra.mxu1 %v1364_v43  ;;  %1397 = vmatpush1.bf16.msra.mxu0 %v1396_v44  ;;  %p1697_p10 = scmp.lt.s32.totalorder %s1695_s14, %s1689_s5 }
 0x1c0   : > { %1367 = vmatprep.subr.bf16.mxu1 %v1366_v47  ;;  %1399 = vmatprep.subr.bf16.mxu0 %v1398_v48 }
 0x1c1   : > { %715 = vmatprep.mubr.f32.mxu1 %v1858_v59  ;;  %804 = vmatprep.mubr.f32.mxu0 %v1858_v59  ;;  %p1698_p12 = por %p1697_p10, %p1696_p0 }
 0x1c2   : > { %716 = vmatmul.mubr.f32.gmra.mrb[6].mxu1 %v2379_v55  ;;  %805 = vmatmul.mubr.f32.gmra.mrb[10].mxu0 %v2379_v55 }
 0x1c3   : > { %1369 = vmatpush1.bf16.msra.mxu1 %v1368_v56  ;;  %1401 = vmatpush1.bf16.msra.mxu0 %v1400_v57  ;;  %p1699_p8 = pnand %p1698_p12, %p1692_p4 }
 0x1c4   : > { %1371 = vmatprep.subr.bf16.mxu1 %v1370_v61  ;;  %1403 = vmatprep.subr.bf16.mxu0 %v1402_v62 }
 0x1c5   : > { %875 = vmatprep.mubr.f32.mxu1 %v1858_v59  ;;  %964 = vmatprep.mubr.f32.mxu0 %v1858_v59 }
 0x1c7   : > { %1373 = vmatpush1.bf16.msra.mxu1 %v1372_v5  ;;  %1405 = vmatpush1.bf16.msra.mxu0 %v1404_v6 }
 0x1c8   : > { %1375 = vmatprep.subr.bf16.mxu1 %v1374_v9  ;;  %1407 = vmatprep.subr.bf16.mxu0 %v1406_v10 }
 0x1cb   : > { %1377 = vmatpush1.bf16.msra.mxu1 %v1376_v18  ;;  %1409 = vmatpush1.bf16.msra.mxu0 %v1408_v19 }
 0x1cc   : > { %1379 = vmatprep.subr.bf16.mxu1 %v1378_v22  ;;  %1411 = vmatprep.subr.bf16.mxu0 %v1410_v23 }
 0x1cf   : > { %1381 = vmatpush1.bf16.msra.mxu1 %v1380_v30  ;;  %1413 = vmatpush1.bf16.msra.mxu0 %v1412_v31 }
 0x1d0   : > { %1383 = vmatprep.subr.bf16.mxu1 %v1382_v34  ;;  %1415 = vmatprep.subr.bf16.mxu0 %v1414_v35 }
 0x1d3   : > { %1385 = vmatpush1.bf16.msra.mxu1 %v1384_v39  ;;  %1417 = vmatpush1.bf16.msra.mxu0 %v1416_v40 }
 0x1d6   : > { %876 = vmatmul.mubr.f32.vlgmr.msra.gmra.mrb[8].mxu1 %v2343_v15  ;;  %965 = vmatmul.mubr.f32.vlgmr.msra.gmra.mrb[12].mxu0 %v2343_v15 }
 0x1d7   : > { %881 = vmatprep.mubr.f32.mxu1 %v1858_v59  ;;  %970 = vmatprep.mubr.f32.mxu0 %v1858_v59 }
 0x1da   : > { %882 = vmatmul.mubr.f32.gmra.mrb[10].mxu1 %v2355_v32  ;;  %971 = vmatmul.mubr.f32.gmra.mrb[14].mxu0 %v2355_v32 }
 0x1db   : > { %887 = vmatprep.mubr.f32.mxu1 %v1858_v59  ;;  %976 = vmatprep.mubr.f32.mxu0 %v1858_v59 }
 0x1de   : > { %888 = vmatmul.mubr.f32.gmra.mrb[12].mxu1 %v2367_v41  ;;  %977 = vmatmul.mubr.f32.gmra.mrb[16].mxu0 %v2367_v41 }
 0x1df   : > { %893 = vmatprep.mubr.f32.mxu1 %v1858_v59  ;;  %982 = vmatprep.mubr.f32.mxu0 %v1858_v59 }
 0x1e2   : > { %894 = vmatmul.mubr.f32.gmra.mrb[14].mxu1 %v2379_v55  ;;  %983 = vmatmul.mubr.f32.gmra.mrb[18].mxu0 %v2379_v55 }
 0x289   : > { %v699_v15 = vpop.f32.mrb[0].mxu1  ;;  %v788_v32 = vpop.f32.mrb[4].mxu0 }
 0x28a   : > { %989 = vst [vmem:[%s2434_s10] sm:$0xff] %v699_v15  ;;  %991 = vst [vmem:[%s2434_s10 + $0x10] sm:$0xff] %v788_v32  ;;  %v701_v59 = vpop.f32.mrb[1].mxu1  ;;  %v790_v41 = vpop.f32.mrb[5].mxu0 }
 0x28b   : > { %990 = vst [vmem:[%s2434_s10 + $0x8] sm:$0xff] %v701_v59  ;;  %992 = vst [vmem:[%s2434_s10 + $0x18] sm:$0xff] %v790_v41 }
 0x28d   : > { %v705_v42 = vpop.f32.mrb[2].mxu1  ;;  %v794_v43 = vpop.f32.mrb[6].mxu0 }
 0x28e   : > { %997 = vst [vmem:[%s2434_s10 + $0x40] sm:$0xff] %v705_v42  ;;  %999 = vst [vmem:[%s2434_s10 + $0x50] sm:$0xff] %v794_v43  ;;  %v707_v44 = vpop.f32.mrb[3].mxu1  ;;  %v796_v45 = vpop.f32.mrb[7].mxu0 }
 0x28f   : > { %998 = vst [vmem:[%s2434_s10 + $0x48] sm:$0xff] %v707_v44  ;;  %1000 = vst [vmem:[%s2434_s10 + $0x58] sm:$0xff] %v796_v45 }
 0x291   : > { %v711_v46 = vpop.f32.mrb[4].mxu1  ;;  %v800_v47 = vpop.f32.mrb[8].mxu0 }
 0x292   : > { %1005 = vst [vmem:[%s2434_s10 + $0x80] sm:$0xff] %v711_v46  ;;  %1007 = vst [vmem:[%s2434_s10 + $0x90] sm:$0xff] %v800_v47  ;;  %v713_v48 = vpop.f32.mrb[5].mxu1  ;;  %v802_v49 = vpop.f32.mrb[9].mxu0 }
 0x293   : > { %1006 = vst [vmem:[%s2434_s10 + $0x88] sm:$0xff] %v713_v48  ;;  %1008 = vst [vmem:[%s2434_s10 + $0x98] sm:$0xff] %v802_v49 }
 0x295   : > { %v717_v50 = vpop.f32.mrb[6].mxu1  ;;  %v806_v51 = vpop.f32.mrb[10].mxu0 }
 0x296   : > { %1013 = vst [vmem:[%s2434_s10 + $0xc0] sm:$0xff] %v717_v50  ;;  %1015 = vst [vmem:[%s2434_s10 + $0xd0] sm:$0xff] %v806_v51  ;;  %v719_v52 = vpop.f32.mrb[7].mxu1  ;;  %v808_v53 = vpop.f32.mrb[11].mxu0 }
 0x297   : > { %1014 = vst [vmem:[%s2434_s10 + $0xc8] sm:$0xff] %v719_v52  ;;  %1016 = vst [vmem:[%s2434_s10 + $0xd8] sm:$0xff] %v808_v53 }
 0x2a9   : > { %v877_v54 = vpop.f32.mrb[8].mxu1  ;;  %v966_v55 = vpop.f32.mrb[12].mxu0 }
 0x2aa   : > { %993 = vst [vmem:[%s2434_s10 + $0x20] sm:$0xff] %v877_v54  ;;  %995 = vst [vmem:[%s2434_s10 + $0x30] sm:$0xff] %v966_v55  ;;  %v879_v56 = vpop.f32.mrb[9].mxu1  ;;  %v968_v57 = vpop.f32.mrb[13].mxu0 }
 0x2ab   : > { %994 = vst [vmem:[%s2434_s10 + $0x28] sm:$0xff] %v879_v56  ;;  %996 = vst [vmem:[%s2434_s10 + $0x38] sm:$0xff] %v968_v57 }
 0x2ad   : > { %v883_v58 = vpop.f32.mrb[10].mxu1  ;;  %v972_v60 = vpop.f32.mrb[14].mxu0 }
 0x2ae   : > { %1001 = vst [vmem:[%s2434_s10 + $0x60] sm:$0xff] %v883_v58  ;;  %1003 = vst [vmem:[%s2434_s10 + $0x70] sm:$0xff] %v972_v60  ;;  %v885_v61 = vpop.f32.mrb[11].mxu1  ;;  %v974_v62 = vpop.f32.mrb[15].mxu0 }
 0x2af   : > { %1002 = vst [vmem:[%s2434_s10 + $0x68] sm:$0xff] %v885_v61  ;;  %1004 = vst [vmem:[%s2434_s10 + $0x78] sm:$0xff] %v974_v62 }
 0x2b1   : > { %v889_v63 = vpop.f32.mrb[12].mxu1  ;;  %v978_v0 = vpop.f32.mrb[16].mxu0 }
 0x2b2   : > { %1009 = vst [vmem:[%s2434_s10 + $0xa0] sm:$0xff] %v889_v63  ;;  %1011 = vst [vmem:[%s2434_s10 + $0xb0] sm:$0xff] %v978_v0  ;;  %v891_v1 = vpop.f32.mrb[13].mxu1  ;;  %v980_v2 = vpop.f32.mrb[17].mxu0 }
 0x2b3   : > { %1010 = vst [vmem:[%s2434_s10 + $0xa8] sm:$0xff] %v891_v1  ;;  %1012 = vst [vmem:[%s2434_s10 + $0xb8] sm:$0xff] %v980_v2 }
 0x2b5   : > { %v895_v3 = vpop.f32.mrb[14].mxu1  ;;  %v984_v4 = vpop.f32.mrb[18].mxu0 }
 0x2b6   : > { %1017 = vst [vmem:[%s2434_s10 + $0xe0] sm:$0xff] %v895_v3  ;;  %1019 = vst [vmem:[%s2434_s10 + $0xf0] sm:$0xff] %v984_v4  ;;  %v897_v5 = vpop.f32.mrb[15].mxu1  ;;  %v986_v6 = vpop.f32.mrb[19].mxu0 }
 0x2b7   : > { %1018 = vst [vmem:[%s2434_s10 + $0xe8] sm:$0xff] %v897_v5  ;;  %1020 = vst [vmem:[%s2434_s10 + $0xf8] sm:$0xff] %v986_v6 }
 0x2b8   : > { %1702 = shalt.err (!%p1699_p8)
}
 0x2b9   : > { %s1703_s1 = scalar_lea.hbm %s2470_s4, 4096  ;;  %s1707_s25 = scalar_lea.hbm %s2640_s0, 32768 }
 0x2ba   : > { %p1704_p6 = scmp.ne.s32.totalorder %s2470_s4, %s1703_s1  ;;  %p1708_p11 = scmp.lt.u32.totalorder %s2470_s4, %s2640_s0 }
 0x2bb   : > { %p1709_p1 = scmp.lt.u32.totalorder %s1707_s25, %s1703_s1  ;;  %p1711_p9 = scmp.lt.u32.totalorder %s1703_s1, %s2470_s4 }
 0x2bc   : > { %p1705_p2 = pnand %p1704_p6, %p2641_p3 }
 0x2bd   : > { %p1710_p13 = por %p1709_p1, %p1708_p11 }
 0x2be   : > { %p1706_p5 = pneg %p1705_p2 }
 0x2bf   : > { %p1712_p7 = por %p1711_p9, %p1710_p13 }
 0x2c1   : > { %p1713_p4 = pnand %p1712_p7, %p1706_p5 }
 0x2c3   : > { %1716 = shalt.err (!%p1713_p4)
}
 0x2c4   : > { %s1860_s7 = smov 1024   ;;  %s1861_s12 = smov 64  }
 0x2c5   : > { %1426 = dma.vmem_to_hbm [thread:$0]  (%p2641_p3), %s2472_s8, 4096, %s2470_s4, %s2480_s18, %s1860_s7, %s1860_s7, %s1861_s12  }
 0x2c6 PF: > { %p1446_p0 = scmp.ge.s32.totalorder %s1847_s28, 2  ;;  %s1055_s21 = sand.u32 1, %s1795_s15  }
 0x2c7   : > { %p2642_p10 = scmp.ne.s32.totalorder %s2623_s29, 0  ;;  %s1056_s5 = scalar_lea.sflag [#allocation4], %s1055_s21 }
 0x2c9   : > { %p1442_p12 = pnand %p1446_p0, %p2642_p10 }
 0x2cb   : > { %1790 = dma.done.wait (!%p1442_p12), %s1056_s5, 4096  }
 0x2cc   : > { %1792 = vsyncadd (!%p1442_p12), %s1056_s5, 4294963200  ;;  %s26_s28 = sadd.s32 1, %s1847_s28   ;;  %s2644_s18 = sld [smem:[#allocation16_spill]] }
 0x2cd   : > { %p2509_p8 = scmp.ge.s32.totalorder %s26_s28, 10   ;;  %s2645_s8 = sld [smem:[#allocation27_spill]] }
 0x2ce   : > { %s2646_s21 = sld [smem:[#allocation17_spill]]  ;;  %s2647_s9 = smov %s2124_s19 }
 0x2cf   : > { %s2648_s29 = sld [smem:[#allocation24_spill]]  ;;  %s2649_s4 = sld [smem:[#allocation26_spill]] }
 0x2d0   : > { %s2651_s15 = smov %s1799_s16  ;;  %s2652_s16 = smov %s1803_s17 }
 0x2d1   : > { %s2653_s17 = smov %s2127_s22  ;;  %s2654_s19 = smov %s1815_s20 }
 0x2d2   : > { %s2656_s22 = smov %s1827_s23  ;;  %s2657_s23 = smov %s2647_s9 }
 0x2d3   : > { %s2655_s20 = smov %s2645_s8  ;;  %s2658_s24 = smov %s1839_s26 }
 0x2d4   : > { %s2659_s25 = smov %s1843_s27  ;;  %25 = sbr.rel (!%p2509_p8) target bundleno = 18 (0x12), region = 118 }
 0x2d5   : > { %s2660_s26 = smov %s2648_s29  ;;  %s2661_s27 = smov %s2649_s4 }
 0x2db   :  { %1061 = vsyncpa [#allocation3], 1 }
 0x2dc   :  { %1063 = vsyncpa [#allocation3 + $0x1], 1 }
 0x2dd   :  { %1064 = vsyncpa [#allocation6], 1 }
 0x2de   :  { %1066 = vsyncpa [#allocation6 + $0x1], 1 }
 0x2df   :  { %1067 = vsyncpa [#allocation9], 1 }
 0x2e0   :  { %1069 = vsyncpa [#allocation9 + $0x1], 1 }
 0x2e1   :  { %1070 = vsyncpa [#allocation4], 1 }
 0x2e2   :  { %1072 = vsyncpa [#allocation4 + $0x1], 1 }

</bundles_post_ra>
